<compile_context>
chip_gen: v6e
topology: v6e:2x2x1
jax: 0.10.0
libtpu: 0.0.40
codegen_flags: <defaults>
</compile_context>

<pallas_src>
import functools
import math

import jax
import jax.numpy as jnp
from jax.experimental import pallas as pl
from jax.experimental.pallas import tpu as pltpu

_TWO_PI = 2.0 * math.pi


def _silu(x):
    # Exact, numerically stable x * sigmoid(x):
    #   exp() is always taken of a non-positive argument -> no overflow.
    pos = x >= 0.0
    z = jnp.exp(jnp.where(pos, -x, x))
    sig = jnp.where(pos, 1.0 / (1.0 + z), z / (1.0 + z))
    return x * sig


def _guidance_wt_kernel(x_ref, wf_ref, we_ref, be_ref, w1ac_ref, w1e_ref,
                        wh_ref, b_ref, w5_ref, b5_ref, out_ref, *, a_plus_s):
    # x_ref: (A+S+1, Bb) rows = [action(0:A); condition(A:A+S); t(A+S)]
    ac = x_ref[0:a_plus_s, :]                       # (A+S, Bb)
    t_row = x_ref[a_plus_s:a_plus_s + 1, :]         # (1, Bb)   f32 time

    # --- GaussianFourierProjection(embed_dim=32), batch-last ---
    x_proj = wf_ref[...] * t_row * _TWO_PI          # (E/2, Bb)
    sin_p = jnp.sin(x_proj)
    cos_p = jnp.cos(x_proj)

    # --- embed Linear(32, 32): concat([sin, cos]) @ We == We_s@sin + We_c@cos
    embed = (jnp.dot(we_ref[0], sin_p, preferred_element_type=jnp.float32)
             + jnp.dot(we_ref[1], cos_p, preferred_element_type=jnp.float32)
             + be_ref[...])                          # (E, Bb)

    # --- layer 1: concat([action, embed, cond]) @ W1 as two matmuls
    #     (action+condition weight rows were pre-concatenated in the wrapper).
    h = _silu(jnp.dot(w1ac_ref[...], ac, preferred_element_type=jnp.float32)
              + jnp.dot(w1e_ref[...], embed, preferred_element_type=jnp.float32)
              + b_ref[0])                            # (H, Bb)

    # --- hidden SiLU layers (weights stacked as (3, H, H), biases (4, H, 1))
    for l in range(3):
        h = _silu(jnp.dot(wh_ref[l], h, preferred_element_type=jnp.float32)
                  + b_ref[l + 1])

    # --- final (H -> 1) layer: lane-dense (1, Bb) store ---
    out_ref[...] = (jnp.dot(w5_ref[...], h, preferred_element_type=jnp.float32)
                    + b5_ref[...])


@functools.partial(jax.jit, static_argnames=("block_b",))
def guidance_wt_forward(action, t, condition, params, block_b=None):
    """action: (B, A) f32, t: (B,) f32, condition: (B, S) f32 -> (B,) f32."""
    B, A = action.shape
    S = condition.shape[-1]

    # As few grid steps as possible: single step up to 2048 lanes.
    # (For dual-TC v7x at large B, pass block_b = round_up(cdiv(B,2),128).)
    bp128 = -(-B // 128) * 128
    if block_b is None:
        block_b = min(bp128, 2048)
    num_blocks = -(-bp128 // block_b)
    Bp = num_blocks * block_b

    (wf, we, be, w1, b1, w2, b2, w3, b3, w4, b4, w5, b5) = params
    E = we.shape[0]            # embed_dim (32)
    E2 = E // 2
    H = w2.shape[0]            # hidden_dim

    # --- single batch-last input slab: rows [action; condition; t] ---
    x = jnp.concatenate([action.astype(jnp.float32),
                         condition.astype(jnp.float32),
                         t.astype(jnp.float32).reshape(B, 1)], axis=-1)
    if Bp != B:
        x = jnp.pad(x, ((0, Bp - B), (0, 0)))
    x_t = x.T                                           # (A+S+1, Bp)

    # --- packed, batch-last (out, in) weights (fused with the call under jit)
    wf_c = wf.reshape(-1, 1)                            # (E/2, 1)
    we_stack = jnp.stack([we[:E2, :].T, we[E2:, :].T])  # (2, E, E/2)
    be_c = be.reshape(-1, 1)                            # (E, 1)
    w1_ac = jnp.concatenate([w1[:A, :], w1[A + E:, :]], axis=0).T   # (H, A+S)
    w1_e = w1[A:A + E, :].T                             # (H, E)
    b_stack = jnp.stack([b1.reshape(-1, 1), b2.reshape(-1, 1),
                         b3.reshape(-1, 1), b4.reshape(-1, 1)])     # (4, H, 1)
    wh = jnp.stack([w2.T, w3.T, w4.T])                  # (3, H, H)
    w5_t = w5.T                                         # (1, H)
    b5_c = b5.reshape(1, 1)                             # (1, 1)

    weights = (wf_c, we_stack, be_c, w1_ac, w1_e, wh, b_stack, w5_t, b5_c)

    def full_spec(arr):
        if arr.ndim == 2:
            return pl.BlockSpec(arr.shape, lambda i: (0, 0))
        return pl.BlockSpec(arr.shape, lambda i: (0, 0, 0))

    in_specs = ([pl.BlockSpec((A + S + 1, block_b), lambda i: (0, i))]
                + [full_spec(w) for w in weights])

    kernel = functools.partial(_guidance_wt_kernel, a_plus_s=A + S)

    out = pl.pallas_call(
        kernel,
        out_shape=jax.ShapeDtypeStruct((1, Bp), jnp.float32),
        grid_spec=pltpu.PrefetchScalarGridSpec(
            num_scalar_prefetch=0,
            grid=(num_blocks,),
            in_specs=in_specs,
            out_specs=pl.BlockSpec((1, block_b), lambda i: (0, i)),
        ),
        compiler_params=pltpu.CompilerParams(
            dimension_semantics=("parallel",)),
    )(x_t, *weights)

    return out[0, :B]  # Squeeze(-1), drop batch padding


def init_params(key, action_dim, state_dim, hidden_dim=32, embed_dim=32, scale=30.0):
    """Deterministic synthetic parameter init (matches module shapes)."""
    ks = jax.random.split(key, 16)
    in_dim = action_dim + embed_dim + state_dim

    def linear(kw, kb, d_in, d_out):
        bound = 1.0 / math.sqrt(d_in)
        w = jax.random.uniform(kw, (d_in, d_out), jnp.float32, -bound, bound)
        b = jax.random.uniform(kb, (1, d_out), jnp.float32, -bound, bound)
        return w, b

    # GaussianFourierProjection.W : (embed_dim // 2,)
    wf = jax.random.normal(ks[0], (1, embed_dim // 2), jnp.float32) * scale
    we, be = linear(ks[1], ks[2], embed_dim, embed_dim)
    w1, b1 = linear(ks[3], ks[4], in_dim, hidden_dim)
    w2, b2 = linear(ks[5], ks[6], hidden_dim, hidden_dim)
    w3, b3 = linear(ks[7], ks[8], hidden_dim, hidden_dim)
    w4, b4 = linear(ks[9], ks[10], hidden_dim, hidden_dim)
    w5, b5 = linear(ks[11], ks[12], hidden_dim, 1)
    return (wf, we, be, w1, b1, w2, b2, w3, b3, w4, b4, w5, b5)


def guidance_wt_reference(action, t, condition, params):
    """Pure-JAX reference mirroring the PyTorch forward."""
    (wf, we, be, w1, b1, w2, b2, w3, b3, w4, b4, w5, b5) = params
    x_proj = t[:, None] * wf * (2.0 * math.pi)
    fourier = jnp.concatenate([jnp.sin(x_proj), jnp.cos(x_proj)], axis=-1)
    embed = fourier @ we + be
    ats = jnp.concatenate([action, embed, condition], axis=-1)
    silu = lambda x: x * jax.nn.sigmoid(x)
    h = silu(ats @ w1 + b1)
    h = silu(h @ w2 + b2)
    h = silu(h @ w3 + b3)
    h = silu(h @ w4 + b4)
    return (h @ w5 + b5)[:, 0]


if __name__ == "__main__":
    B, action_dim, state_dim, hidden_dim = 256, 8, 16, 32

    key = jax.random.PRNGKey(0)
    k_a, k_t, k_c, k_p = jax.random.split(key, 4)

    action = jax.random.normal(k_a, (B, action_dim), jnp.float32)
    t = jax.random.uniform(k_t, (B,), jnp.float32)
    condition = jax.random.normal(k_c, (B, state_dim), jnp.float32)
    params = init_params(k_p, action_dim, state_dim, hidden_dim=hidden_dim)

    out = guidance_wt_forward(action, t, condition, params)
    out = jax.block_until_ready(out)

    ref = guidance_wt_reference(action, t, condition, params)
    assert out.shape == (B,)
    # Tolerance covers transcendental (sin/cos/exp) implementation differences;
    # SiLU uses an exact sigmoid (no approximate reciprocal).
    assert jnp.allclose(out, ref, atol=5e-3, rtol=5e-3), (out, ref)

    print("KERNEL_OK")
</pallas_src>

<mosaic_0001>
module attributes {stable_mosaic.version = 11 : i64} {
  func.func @_guidance_wt_kernel(%arg0: i32, %arg1: memref<25x256xf32, #tpu.memory_space<vmem>>, %arg2: memref<16x1xf32, #tpu.memory_space<vmem>>, %arg3: memref<2x32x16xf32, #tpu.memory_space<vmem>>, %arg4: memref<32x1xf32, #tpu.memory_space<vmem>>, %arg5: memref<32x24xf32, #tpu.memory_space<vmem>>, %arg6: memref<32x32xf32, #tpu.memory_space<vmem>>, %arg7: memref<3x32x32xf32, #tpu.memory_space<vmem>>, %arg8: memref<4x32x1xf32, #tpu.memory_space<vmem>>, %arg9: memref<1x32xf32, #tpu.memory_space<vmem>>, %arg10: memref<1x1xf32, #tpu.memory_space<vmem>>, %arg11: memref<1x256xf32, #tpu.memory_space<vmem>>) attributes {dimension_semantics = [#tpu.dimension_semantics<parallel>], iteration_bounds = array<i64: 1>, scalar_prefetch = 0 : i64, scratch_operands = 0 : i64, tpu.core_type = #tpu.core_type<tc>, window_params = [{transform_indices = @transform_0, window_bounds = array<i64: 25, 256>}, {pipeline_mode = #tpu.pipeline_mode<synchronous>, transform_indices = @transform_1, window_bounds = array<i64: 16, 1>}, {pipeline_mode = #tpu.pipeline_mode<synchronous>, transform_indices = @transform_2, window_bounds = array<i64: 2, 32, 16>}, {pipeline_mode = #tpu.pipeline_mode<synchronous>, transform_indices = @transform_3, window_bounds = array<i64: 32, 1>}, {pipeline_mode = #tpu.pipeline_mode<synchronous>, transform_indices = @transform_4, window_bounds = array<i64: 32, 24>}, {pipeline_mode = #tpu.pipeline_mode<synchronous>, transform_indices = @transform_5, window_bounds = array<i64: 32, 32>}, {pipeline_mode = #tpu.pipeline_mode<synchronous>, transform_indices = @transform_6, window_bounds = array<i64: 3, 32, 32>}, {pipeline_mode = #tpu.pipeline_mode<synchronous>, transform_indices = @transform_7, window_bounds = array<i64: 4, 32, 1>}, {pipeline_mode = #tpu.pipeline_mode<synchronous>, transform_indices = @transform_8, window_bounds = array<i64: 1, 32>}, {pipeline_mode = #tpu.pipeline_mode<synchronous>, transform_indices = @transform_9, window_bounds = array<i64: 1, 1>}, {transform_indices = @transform_10, window_bounds = array<i64: 1, 256>}]} {
    %c0 = arith.constant 0 : index
    %c0_0 = arith.constant 0 : index
    %0 = vector.load %arg1[%c0, %c0_0] : memref<25x256xf32, #tpu.memory_space<vmem>>, vector<24x256xf32>
    %c24 = arith.constant 24 : index
    %c0_1 = arith.constant 0 : index
    %1 = vector.load %arg1[%c24, %c0_1] : memref<25x256xf32, #tpu.memory_space<vmem>>, vector<1x256xf32>
    %c0_2 = arith.constant 0 : index
    %c0_3 = arith.constant 0 : index
    %2 = vector.load %arg2[%c0_2, %c0_3] : memref<16x1xf32, #tpu.memory_space<vmem>>, vector<16x1xf32>
    %3 = vector.broadcast %2 : vector<16x1xf32> to vector<16x256xf32>
    %4 = vector.broadcast %1 : vector<1x256xf32> to vector<16x256xf32>
    %5 = arith.mulf %3, %4 : vector<16x256xf32>
    %cst = arith.constant 6.28318548 : f32
    %6 = vector.broadcast %cst : f32 to vector<16x256xf32>
    %7 = arith.mulf %5, %6 : vector<16x256xf32>
    %8 = math.sin %7 : vector<16x256xf32>
    %9 = math.cos %7 : vector<16x256xf32>
    %c0_4 = arith.constant 0 : index
    %c0_5 = arith.constant 0 : index
    %c0_6 = arith.constant 0 : index
    %10 = vector.load %arg3[%c0_4, %c0_5, %c0_6] : memref<2x32x16xf32, #tpu.memory_space<vmem>>, vector<1x32x16xf32>
    %11 = vector.shape_cast %10 : vector<1x32x16xf32> to vector<32x16xf32>
    %cst_7 = arith.constant dense<0.000000e+00> : vector<32x256xf32>
    %12 = tpu.matmul %11, %8, %cst_7 {dimension_numbers = #tpu.dot_dimension_numbers<[1], [0], [0], [1], [0, 0, 1, 1], [], []>} : vector<32x16xf32>, vector<16x256xf32>, vector<32x256xf32> -> vector<32x256xf32>
    %c1 = arith.constant 1 : index
    %c0_8 = arith.constant 0 : index
    %c0_9 = arith.constant 0 : index
    %13 = vector.load %arg3[%c1, %c0_8, %c0_9] : memref<2x32x16xf32, #tpu.memory_space<vmem>>, vector<1x32x16xf32>
    %14 = vector.shape_cast %13 : vector<1x32x16xf32> to vector<32x16xf32>
    %cst_10 = arith.constant dense<0.000000e+00> : vector<32x256xf32>
    %15 = tpu.matmul %14, %9, %cst_10 {dimension_numbers = #tpu.dot_dimension_numbers<[1], [0], [0], [1], [0, 0, 1, 1], [], []>} : vector<32x16xf32>, vector<16x256xf32>, vector<32x256xf32> -> vector<32x256xf32>
    %16 = arith.addf %12, %15 : vector<32x256xf32>
    %c0_11 = arith.constant 0 : index
    %c0_12 = arith.constant 0 : index
    %17 = vector.load %arg4[%c0_11, %c0_12] : memref<32x1xf32, #tpu.memory_space<vmem>>, vector<32x1xf32>
    %18 = vector.broadcast %17 : vector<32x1xf32> to vector<32x256xf32>
    %19 = arith.addf %16, %18 : vector<32x256xf32>
    %c0_13 = arith.constant 0 : index
    %c0_14 = arith.constant 0 : index
    %20 = vector.load %arg5[%c0_13, %c0_14] : memref<32x24xf32, #tpu.memory_space<vmem>>, vector<32x24xf32>
    %cst_15 = arith.constant dense<0.000000e+00> : vector<32x256xf32>
    %21 = tpu.matmul %20, %0, %cst_15 {dimension_numbers = #tpu.dot_dimension_numbers<[1], [0], [0], [1], [0, 0, 1, 1], [], []>} : vector<32x24xf32>, vector<24x256xf32>, vector<32x256xf32> -> vector<32x256xf32>
    %c0_16 = arith.constant 0 : index
    %c0_17 = arith.constant 0 : index
    %22 = vector.load %arg6[%c0_16, %c0_17] : memref<32x32xf32, #tpu.memory_space<vmem>>, vector<32x32xf32>
    %cst_18 = arith.constant dense<0.000000e+00> : vector<32x256xf32>
    %23 = tpu.matmul %22, %19, %cst_18 {dimension_numbers = #tpu.dot_dimension_numbers<[1], [0], [0], [1], [0, 0, 1, 1], [], []>} : vector<32x32xf32>, vector<32x256xf32>, vector<32x256xf32> -> vector<32x256xf32>
    %24 = arith.addf %21, %23 : vector<32x256xf32>
    %c0_19 = arith.constant 0 : index
    %c0_20 = arith.constant 0 : index
    %c0_21 = arith.constant 0 : index
    %25 = vector.load %arg8[%c0_19, %c0_20, %c0_21] : memref<4x32x1xf32, #tpu.memory_space<vmem>>, vector<1x32x1xf32>
    %26 = vector.shape_cast %25 : vector<1x32x1xf32> to vector<32x1xf32>
    %27 = vector.broadcast %26 : vector<32x1xf32> to vector<32x256xf32>
    %28 = arith.addf %24, %27 : vector<32x256xf32>
    %cst_22 = arith.constant 0.000000e+00 : f32
    %29 = vector.broadcast %cst_22 : f32 to vector<32x256xf32>
    %30 = arith.cmpf oge, %28, %29 : vector<32x256xf32>
    %cst_23 = arith.constant 0.000000e+00 : f32
    %31 = vector.broadcast %cst_23 : f32 to vector<32x256xf32>
    %32 = arith.subf %31, %28 : vector<32x256xf32>
    %33 = arith.select %30, %32, %28 : vector<32x256xi1>, vector<32x256xf32>
    %34 = math.exp %33 : vector<32x256xf32>
    %cst_24 = arith.constant 1.000000e+00 : f32
    %35 = vector.broadcast %cst_24 : f32 to vector<32x256xf32>
    %36 = arith.addf %35, %34 : vector<32x256xf32>
    %cst_25 = arith.constant 1.000000e+00 : f32
    %37 = vector.broadcast %cst_25 : f32 to vector<32x256xf32>
    %38 = arith.divf %37, %36 : vector<32x256xf32>
    %cst_26 = arith.constant 1.000000e+00 : f32
    %39 = vector.broadcast %cst_26 : f32 to vector<32x256xf32>
    %40 = arith.addf %39, %34 : vector<32x256xf32>
    %41 = arith.divf %34, %40 : vector<32x256xf32>
    %42 = arith.select %30, %38, %41 : vector<32x256xi1>, vector<32x256xf32>
    %43 = arith.mulf %28, %42 : vector<32x256xf32>
    %c0_27 = arith.constant 0 : index
    %c0_28 = arith.constant 0 : index
    %c0_29 = arith.constant 0 : index
    %44 = vector.load %arg7[%c0_27, %c0_28, %c0_29] : memref<3x32x32xf32, #tpu.memory_space<vmem>>, vector<1x32x32xf32>
    %45 = vector.shape_cast %44 : vector<1x32x32xf32> to vector<32x32xf32>
    %cst_30 = arith.constant dense<0.000000e+00> : vector<32x256xf32>
    %46 = tpu.matmul %45, %43, %cst_30 {dimension_numbers = #tpu.dot_dimension_numbers<[1], [0], [0], [1], [0, 0, 1, 1], [], []>} : vector<32x32xf32>, vector<32x256xf32>, vector<32x256xf32> -> vector<32x256xf32>
    %c1_31 = arith.constant 1 : index
    %c0_32 = arith.constant 0 : index
    %c0_33 = arith.constant 0 : index
    %47 = vector.load %arg8[%c1_31, %c0_32, %c0_33] : memref<4x32x1xf32, #tpu.memory_space<vmem>>, vector<1x32x1xf32>
    %48 = vector.shape_cast %47 : vector<1x32x1xf32> to vector<32x1xf32>
    %49 = vector.broadcast %48 : vector<32x1xf32> to vector<32x256xf32>
    %50 = arith.addf %46, %49 : vector<32x256xf32>
    %cst_34 = arith.constant 0.000000e+00 : f32
    %51 = vector.broadcast %cst_34 : f32 to vector<32x256xf32>
    %52 = arith.cmpf oge, %50, %51 : vector<32x256xf32>
    %cst_35 = arith.constant 0.000000e+00 : f32
    %53 = vector.broadcast %cst_35 : f32 to vector<32x256xf32>
    %54 = arith.subf %53, %50 : vector<32x256xf32>
    %55 = arith.select %52, %54, %50 : vector<32x256xi1>, vector<32x256xf32>
    %56 = math.exp %55 : vector<32x256xf32>
    %cst_36 = arith.constant 1.000000e+00 : f32
    %57 = vector.broadcast %cst_36 : f32 to vector<32x256xf32>
    %58 = arith.addf %57, %56 : vector<32x256xf32>
    %cst_37 = arith.constant 1.000000e+00 : f32
    %59 = vector.broadcast %cst_37 : f32 to vector<32x256xf32>
    %60 = arith.divf %59, %58 : vector<32x256xf32>
    %cst_38 = arith.constant 1.000000e+00 : f32
    %61 = vector.broadcast %cst_38 : f32 to vector<32x256xf32>
    %62 = arith.addf %61, %56 : vector<32x256xf32>
    %63 = arith.divf %56, %62 : vector<32x256xf32>
    %64 = arith.select %52, %60, %63 : vector<32x256xi1>, vector<32x256xf32>
    %65 = arith.mulf %50, %64 : vector<32x256xf32>
    %c1_39 = arith.constant 1 : index
    %c0_40 = arith.constant 0 : index
    %c0_41 = arith.constant 0 : index
    %66 = vector.load %arg7[%c1_39, %c0_40, %c0_41] : memref<3x32x32xf32, #tpu.memory_space<vmem>>, vector<1x32x32xf32>
    %67 = vector.shape_cast %66 : vector<1x32x32xf32> to vector<32x32xf32>
    %cst_42 = arith.constant dense<0.000000e+00> : vector<32x256xf32>
    %68 = tpu.matmul %67, %65, %cst_42 {dimension_numbers = #tpu.dot_dimension_numbers<[1], [0], [0], [1], [0, 0, 1, 1], [], []>} : vector<32x32xf32>, vector<32x256xf32>, vector<32x256xf32> -> vector<32x256xf32>
    %c2 = arith.constant 2 : index
    %c0_43 = arith.constant 0 : index
    %c0_44 = arith.constant 0 : index
    %69 = vector.load %arg8[%c2, %c0_43, %c0_44] : memref<4x32x1xf32, #tpu.memory_space<vmem>>, vector<1x32x1xf32>
    %70 = vector.shape_cast %69 : vector<1x32x1xf32> to vector<32x1xf32>
    %71 = vector.broadcast %70 : vector<32x1xf32> to vector<32x256xf32>
    %72 = arith.addf %68, %71 : vector<32x256xf32>
    %cst_45 = arith.constant 0.000000e+00 : f32
    %73 = vector.broadcast %cst_45 : f32 to vector<32x256xf32>
    %74 = arith.cmpf oge, %72, %73 : vector<32x256xf32>
    %cst_46 = arith.constant 0.000000e+00 : f32
    %75 = vector.broadcast %cst_46 : f32 to vector<32x256xf32>
    %76 = arith.subf %75, %72 : vector<32x256xf32>
    %77 = arith.select %74, %76, %72 : vector<32x256xi1>, vector<32x256xf32>
    %78 = math.exp %77 : vector<32x256xf32>
    %cst_47 = arith.constant 1.000000e+00 : f32
    %79 = vector.broadcast %cst_47 : f32 to vector<32x256xf32>
    %80 = arith.addf %79, %78 : vector<32x256xf32>
    %cst_48 = arith.constant 1.000000e+00 : f32
    %81 = vector.broadcast %cst_48 : f32 to vector<32x256xf32>
    %82 = arith.divf %81, %80 : vector<32x256xf32>
    %cst_49 = arith.constant 1.000000e+00 : f32
    %83 = vector.broadcast %cst_49 : f32 to vector<32x256xf32>
    %84 = arith.addf %83, %78 : vector<32x256xf32>
    %85 = arith.divf %78, %84 : vector<32x256xf32>
    %86 = arith.select %74, %82, %85 : vector<32x256xi1>, vector<32x256xf32>
    %87 = arith.mulf %72, %86 : vector<32x256xf32>
    %c2_50 = arith.constant 2 : index
    %c0_51 = arith.constant 0 : index
    %c0_52 = arith.constant 0 : index
    %88 = vector.load %arg7[%c2_50, %c0_51, %c0_52] : memref<3x32x32xf32, #tpu.memory_space<vmem>>, vector<1x32x32xf32>
    %89 = vector.shape_cast %88 : vector<1x32x32xf32> to vector<32x32xf32>
    %cst_53 = arith.constant dense<0.000000e+00> : vector<32x256xf32>
    %90 = tpu.matmul %89, %87, %cst_53 {dimension_numbers = #tpu.dot_dimension_numbers<[1], [0], [0], [1], [0, 0, 1, 1], [], []>} : vector<32x32xf32>, vector<32x256xf32>, vector<32x256xf32> -> vector<32x256xf32>
    %c3 = arith.constant 3 : index
    %c0_54 = arith.constant 0 : index
    %c0_55 = arith.constant 0 : index
    %91 = vector.load %arg8[%c3, %c0_54, %c0_55] : memref<4x32x1xf32, #tpu.memory_space<vmem>>, vector<1x32x1xf32>
    %92 = vector.shape_cast %91 : vector<1x32x1xf32> to vector<32x1xf32>
    %93 = vector.broadcast %92 : vector<32x1xf32> to vector<32x256xf32>
    %94 = arith.addf %90, %93 : vector<32x256xf32>
    %cst_56 = arith.constant 0.000000e+00 : f32
    %95 = vector.broadcast %cst_56 : f32 to vector<32x256xf32>
    %96 = arith.cmpf oge, %94, %95 : vector<32x256xf32>
    %cst_57 = arith.constant 0.000000e+00 : f32
    %97 = vector.broadcast %cst_57 : f32 to vector<32x256xf32>
    %98 = arith.subf %97, %94 : vector<32x256xf32>
    %99 = arith.select %96, %98, %94 : vector<32x256xi1>, vector<32x256xf32>
    %100 = math.exp %99 : vector<32x256xf32>
    %cst_58 = arith.constant 1.000000e+00 : f32
    %101 = vector.broadcast %cst_58 : f32 to vector<32x256xf32>
    %102 = arith.addf %101, %100 : vector<32x256xf32>
    %cst_59 = arith.constant 1.000000e+00 : f32
    %103 = vector.broadcast %cst_59 : f32 to vector<32x256xf32>
    %104 = arith.divf %103, %102 : vector<32x256xf32>
    %cst_60 = arith.constant 1.000000e+00 : f32
    %105 = vector.broadcast %cst_60 : f32 to vector<32x256xf32>
    %106 = arith.addf %105, %100 : vector<32x256xf32>
    %107 = arith.divf %100, %106 : vector<32x256xf32>
    %108 = arith.select %96, %104, %107 : vector<32x256xi1>, vector<32x256xf32>
    %109 = arith.mulf %94, %108 : vector<32x256xf32>
    %c0_61 = arith.constant 0 : index
    %c0_62 = arith.constant 0 : index
    %110 = vector.load %arg9[%c0_61, %c0_62] : memref<1x32xf32, #tpu.memory_space<vmem>>, vector<1x32xf32>
    %cst_63 = arith.constant dense<0.000000e+00> : vector<1x256xf32>
    %111 = tpu.matmul %110, %109, %cst_63 {dimension_numbers = #tpu.dot_dimension_numbers<[1], [0], [0], [1], [0, 0, 1, 1], [], []>} : vector<1x32xf32>, vector<32x256xf32>, vector<1x256xf32> -> vector<1x256xf32>
    %c0_64 = arith.constant 0 : index
    %c0_65 = arith.constant 0 : index
    %112 = vector.load %arg10[%c0_64, %c0_65] : memref<1x1xf32, #tpu.memory_space<vmem>>, vector<1x1xf32>
    %113 = vector.broadcast %112 : vector<1x1xf32> to vector<1x256xf32>
    %114 = arith.addf %111, %113 : vector<1x256xf32>
    %c0_66 = arith.constant 0 : index
    %c0_67 = arith.constant 0 : index
    %115 = vector.load %arg11[%c0_66, %c0_67] : memref<1x256xf32, #tpu.memory_space<vmem>>, vector<1x256xf32>
    tpu.vector_store %arg11[%c0_66, %c0_67], %114 {strides = array<i32>} : memref<1x256xf32, #tpu.memory_space<vmem>>, vector<1x256xf32>,
    return
  }
  func.func @transform_0(%arg0: i32) -> (i32, i32) {
    %c0_i32 = arith.constant 0 : i32
    %c0_i32_0 = arith.constant 0 : i32
    return %c0_i32, %arg0 : i32, i32
  }
  func.func @transform_1(%arg0: i32) -> (i32, i32) {
    %c0_i32 = arith.constant 0 : i32
    %c0_i32_0 = arith.constant 0 : i32
    %c0_i32_1 = arith.constant 0 : i32
    return %c0_i32, %c0_i32_0 : i32, i32
  }
  func.func @transform_2(%arg0: i32) -> (i32, i32, i32) {
    %c0_i32 = arith.constant 0 : i32
    %c0_i32_0 = arith.constant 0 : i32
    %c0_i32_1 = arith.constant 0 : i32
    %c0_i32_2 = arith.constant 0 : i32
    return %c0_i32, %c0_i32_0, %c0_i32_1 : i32, i32, i32
  }
  func.func @transform_3(%arg0: i32) -> (i32, i32) {
    %c0_i32 = arith.constant 0 : i32
    %c0_i32_0 = arith.constant 0 : i32
    %c0_i32_1 = arith.constant 0 : i32
    return %c0_i32, %c0_i32_0 : i32, i32
  }
  func.func @transform_4(%arg0: i32) -> (i32, i32) {
    %c0_i32 = arith.constant 0 : i32
    %c0_i32_0 = arith.constant 0 : i32
    %c0_i32_1 = arith.constant 0 : i32
    return %c0_i32, %c0_i32_0 : i32, i32
  }
  func.func @transform_5(%arg0: i32) -> (i32, i32) {
    %c0_i32 = arith.constant 0 : i32
    %c0_i32_0 = arith.constant 0 : i32
    %c0_i32_1 = arith.constant 0 : i32
    return %c0_i32, %c0_i32_0 : i32, i32
  }
  func.func @transform_6(%arg0: i32) -> (i32, i32, i32) {
    %c0_i32 = arith.constant 0 : i32
    %c0_i32_0 = arith.constant 0 : i32
    %c0_i32_1 = arith.constant 0 : i32
    %c0_i32_2 = arith.constant 0 : i32
    return %c0_i32, %c0_i32_0, %c0_i32_1 : i32, i32, i32
  }
  func.func @transform_7(%arg0: i32) -> (i32, i32, i32) {
    %c0_i32 = arith.constant 0 : i32
    %c0_i32_0 = arith.constant 0 : i32
    %c0_i32_1 = arith.constant 0 : i32
    %c0_i32_2 = arith.constant 0 : i32
    return %c0_i32, %c0_i32_0, %c0_i32_1 : i32, i32, i32
  }
  func.func @transform_8(%arg0: i32) -> (i32, i32) {
    %c0_i32 = arith.constant 0 : i32
    %c0_i32_0 = arith.constant 0 : i32
    %c0_i32_1 = arith.constant 0 : i32
    return %c0_i32, %c0_i32_0 : i32, i32
  }
  func.func @transform_9(%arg0: i32) -> (i32, i32) {
    %c0_i32 = arith.constant 0 : i32
    %c0_i32_0 = arith.constant 0 : i32
    %c0_i32_1 = arith.constant 0 : i32
    return %c0_i32, %c0_i32_0 : i32, i32
  }
  func.func @transform_10(%arg0: i32) -> (i32, i32) {
    %c0_i32 = arith.constant 0 : i32
    %c0_i32_0 = arith.constant 0 : i32
    return %c0_i32, %arg0 : i32, i32
  }
}

</mosaic_0001>

<bundles_post_ra>
// kernel: guidance_wt_forward.1
= control target key start
LH: loop header
LB: loop body
LE: loop exit
PB: predicated region body
PF: predicated region fallthrough
CT: control target
= control target key end

     0   :  { %s3525_s0 = inlined_call_operand.vmem [shape: f32[25,256], index: 0, kind: input, shape index: {}]   ;;  %s3526_s1 = inlined_call_operand.vmem [shape: f32[16,1], index: 1, kind: input, shape index: {}]   ;;  %s3527_s2 = inlined_call_operand.vmem [shape: f32[2,32,16], index: 2, kind: input, shape index: {}]   ;;  %s3528_s3 = inlined_call_operand.vmem [shape: f32[32,1], index: 3, kind: input, shape index: {}]   ;;  %s3529_s4 = inlined_call_operand.vmem [shape: f32[32,24], index: 4, kind: input, shape index: {}]   ;;  %s3530_s5 = inlined_call_operand.vmem [shape: f32[32,32], index: 5, kind: input, shape index: {}]   ;;  %s3531_s6 = inlined_call_operand.vmem [shape: f32[3,32,32], index: 6, kind: input, shape index: {}]   ;;  %s3532_s7 = inlined_call_operand.vmem [shape: f32[4,32,1], index: 7, kind: input, shape index: {}]   ;;  %s3533_s8 = inlined_call_operand.vmem [shape: f32[1,32], index: 8, kind: input, shape index: {}]   ;;  %s3534_s9 = inlined_call_operand.<no memory space> [shape: f32[1,1], index: 9, kind: input, shape index: {}]   ;;  %s3535_s10 = inlined_call_operand.hbm [shape: f32[1,256], index: 10, kind: output, shape index: {}]  }
   0x1   :  { %v15_v0 = vstv %s3534_s9 }
   0x2   :  { %16 = vst [vmem:[#allocation2] sm:$0x1] %v15_v0 }
   0x3   :  { %v47_v1 = vld [vmem:[%s3526_s1 + $0x8] sm:$0xff]  ;;  %v2543_v2 = vmov 0   ;;  %v46_v3 = vld [vmem:[%s3526_s1] sm:$0xff] }
   0x4   :  { %2375 = vset.pattern.permute.xlu0 %v2543_v2  ;;  %2376 = vset.pattern.permute.xlu1 %v2543_v2 }
   0x5   :  { %55 = vperm.xlu0 %2375, %v47_v1  }
   0x6   :  { %17 = vsyncpa [#allocation4], 0  ;;  %v1118_v4 = vld [vmem:[%s3528_s3 + $0x8] sm:$0xff]  ;;  %v1364_v5 = vld [vmem:[%s3532_s7 + $0x18] sm:$0xff]  ;;  %v59_v14 = vlaneseq  ;;  %v2544_v59 = vmov 2475754826  }
   0x7   :  { %v1362_v6 = vld [vmem:[%s3532_s7 + $0x8] sm:$0xff]  ;;  %v2315_v7 = vld [vmem:[%s3532_s7 + $0x38] sm:$0xff]  ;;  %v2545_v61 = vmov 2102212464   ;;  %v2546_v63 = vmov 2131351028  }
   0x8   :  { %v2313_v8 = vld [vmem:[%s3532_s7 + $0x28] sm:$0xff]  ;;  %v2327_v9 = vld [vmem:[%s3532_s7 + $0x58] sm:$0xff]  ;;  %v2645_v15 = vshrl.u32 %v59_v14, 7  ;;  %v2547_v1 = vmov 920167782   ;;  %s2552_s26 = smov [#allocation3]  }
   0x9   :  { %50 = vperm.xlu0 %2375, %v46_v3   ;;  %v2325_v10 = vld [vmem:[%s3532_s7 + $0x48] sm:$0xff]  ;;  %v2339_v11 = vld [vmem:[%s3532_s7 + $0x78] sm:$0xff]  ;;  %v2138_v13 = vld [vmem:[#allocation2] sm:$0x1] }
   0xa   :  { %v2337_v12 = vld [vmem:[%s3532_s7 + $0x68] sm:$0xff]  ;;  %v61_v16 = vsub.s32 0, %v2645_v15  ;;  %v65_v17 = vsub.s32 1, %v2645_v15  ;;  %v2259_v18 = vld [vmem:[%s3525_s0 + $0x30] ss:$8 sm:$0x3] }
   0xc   :  { %v62_v19 = vrot.slane %v2259_v18, %v61_v16  ;;  %v66_v20 = vrot.slane %v2259_v18, %v65_v17 }
   0xd   :  { %1128 = vperm.xlu0 %2375, %v1118_v4  }
  0x11   :  { %1382 = vperm.xlu0 %2375, %v1364_v5   ;;  %v2548_v5 = vmov 683565275  }
  0x15   :  { %1372 = vperm.xlu0 %2375, %v1362_v6  }
  0x19   :  { %1507 = vperm.xlu0 %2375, %v2315_v7  }
  0x1d   :  { %1497 = vperm.xlu0 %2375, %v2313_v8  }
  0x21   :  { %1726 = vperm.xlu0 %2375, %v2327_v9  }
  0x25   :  { %1716 = vperm.xlu0 %2375, %v2325_v10  }
  0x29   :  { %1945 = vperm.xlu0 %2375, %v2339_v11  }
  0x2d   :  { %1935 = vperm.xlu0 %2375, %v2337_v12  }
  0x31   :  { %2141 = vperm.xlu0 %2375, %v2138_v13  }
  0x80   :  { %v56_v21 = vpop.permute.xlu0 %55 }
  0x81   :  { %v71_v22 = vmul.f32 %v62_v19, %v56_v21  ;;  %v72_v23 = vmul.f32 %v66_v20, %v56_v21 }
  0x83   :  { %v2654_v24 = vmul.f32 6.2831855, %v71_v22  ;;  %v2656_v25 = vmul.f32 6.2831855, %v72_v23  ;;  %v2549_v23 = vmov 1326507024  }
  0x84   :  { %v51_v26 = vpop.permute.xlu0 %50 }
  0x85   :  { %v288_v27 = vand.u32 2139095040, %v2654_v24  ;;  %v392_v28 = vand.u32 2139095040, %v2656_v25  ;;  %v69_v29 = vmul.f32 %v62_v19, %v51_v26  ;;  %v70_v30 = vmul.f32 %v66_v20, %v51_v26 }
  0x86   :  { %v389_v42 = vand.u32 2147483647, %v2656_v25  ;;  %v285_v43 = vand.u32 2147483647, %v2654_v24 }
  0x87   :  { %v289_v31 = vshrl.u32 %v288_v27, 23  ;;  %v393_v32 = vshrl.u32 %v392_v28, 23  ;;  %v2660_v33 = vmul.f32 6.2831855, %v69_v29  ;;  %v2662_v34 = vmul.f32 6.2831855, %v70_v30 }
  0x88   :  { %v396_v49 = vand.u32 8388607, %v389_v42  ;;  %v292_v51 = vand.u32 8388607, %v285_v43 }
  0x89   :  { %v2268_v35 = vadd.s32 4294967169, %v289_v31  ;;  %v2272_v36 = vadd.s32 4294967169, %v393_v32  ;;  %v80_v37 = vand.u32 2139095040, %v2660_v33  ;;  %v184_v38 = vand.u32 2139095040, %v2662_v34 }
  0x8a   :  { %v397_v55 = vor.u32 8388608, %v396_v49  ;;  %v293_v57 = vor.u32 8388608, %v292_v51  ;;  %v181_v3 = vand.u32 2147483647, %v2662_v34 }
  0x8b   :  { %v399_v39 = vadd.s32 1, %v2272_v36  ;;  %v81_v40 = vshrl.u32 %v80_v37, 23  ;;  %v185_v41 = vshrl.u32 %v184_v38, 23  ;;  %v295_v44 = vadd.s32 1, %v2268_v35 }
  0x8c   :  { %v2684_v8 = vshll.u32 %v397_v55, 8  ;;  %v2688_v12 = vshll.u32 %v293_v57, 8  ;;  %v2702_v30 = vand.u32 8388607, %v181_v3 }
  0x8d   :  { %vm400_vm0 = vcmp.gt.s32.totalorder %v399_v39, 0  ;;  %v2264_v45 = vadd.s32 4294967169, %v185_v41  ;;  %v2260_v47 = vadd.s32 4294967169, %v81_v40  ;;  %vm296_vm1 = vcmp.gt.s32.totalorder %v295_v44, 0 }
  0x8e   :  { %v401_v46 = vsel %vm400_vm0, %v399_v39, 0  ;;  %v297_v56 = vsel %vm296_vm1, %v295_v44, 0 }
  0x8f   :  { %v403_v48 = vand.u32 31, %v401_v46  ;;  %v191_v50 = vadd.s32 1, %v2264_v45  ;;  %v87_v53 = vadd.s32 1, %v2260_v47  ;;  %v299_v4 = vand.u32 31, %v297_v56 }
  0x90   :  { %v402_v9 = vshrl.u32 %v401_v46, 5  ;;  %v2697_v27 = vshrl.u32 %v297_v56, 5 }
  0x91   :  { %v404_v52 = vsub.s32 32, %v403_v48  ;;  %vm192_vm2 = vcmp.gt.s32.totalorder %v191_v50, 0  ;;  %vm88_vm3 = vcmp.gt.s32.totalorder %v87_v53, 0  ;;  %v406_v6 = vshll.u32 %v2548_v5, %v403_v48 }
  0x92   :  { %v2672_v54 = vsel %vm192_vm2, %v191_v50, 0  ;;  %v412_v7 = vshll.u32 %v2546_v63, %v403_v48  ;;  %v409_v10 = vshll.u32 %v2544_v59, %v403_v48  ;;  %v415_v11 = vshll.u32 %v2545_v61, %v403_v48 }
  0x93   :  { %v2675_v58 = vand.u32 31, %v2672_v54  ;;  %v407_v60 = vshrl.u32 %v2544_v59, %v404_v52  ;;  %v413_v62 = vshrl.u32 %v2545_v61, %v404_v52  ;;  %v410_v0 = vshrl.u32 %v2546_v63, %v404_v52 }
  0x94   :  { %v416_v2 = vshrl.u32 %v2547_v1, %v404_v52  ;;  %v2690_v13 = vsel %vm88_vm3, %v87_v53, 0  ;;  %v418_v22 = vshll.u32 %v2547_v1, %v403_v48  ;;  %v419_v26 = vshrl.u32 %v2549_v23, %v404_v52 }
  0x95   :  { %v2693_v17 = vsub.s32 32, %v2675_v58  ;;  %v408_v18 = vor.u32 %v407_v60, %v406_v6  ;;  %v414_v19 = vor.u32 %v413_v62, %v412_v7  ;;  %v411_v20 = vor.u32 %v410_v0, %v409_v10 }
  0x96   :  { %v417_v21 = vor.u32 %v416_v2, %v415_v11  ;;  %v300_v28 = vsub.s32 32, %v299_v4  ;;  %v405_v29 = vshrl.u32 %v2548_v5, %v404_v52  ;;  %v2705_v31 = vand.u32 31, %v2690_v13 }
  0x97   :  { %v420_v32 = vor.u32 %v419_v26, %v418_v22  ;;  %vm421_vm4 = vcmp.lt.s32.totalorder %v402_v9, 1  ;;  %vm424_vm5 = vcmp.lt.s32.totalorder %v402_v9, 4  ;;  %v2709_v35 = vshrl.u32 %v2547_v1, %v2693_v17 }
  0x98   :  { %vm423_vm6 = vcmp.lt.s32.totalorder %v402_v9, 3  ;;  %v425_v36 = vsel %vm421_vm4, %v405_v29, %v408_v18  ;;  %v426_v37 = vsel %vm424_vm5, %v414_v19, 2102212464  ;;  %v429_v39 = vsel %vm421_vm4, %v408_v18, %v411_v20 }
  0x99   :  { %v427_v38 = vsel %vm423_vm6, %v411_v20, %v426_v37  ;;  %v430_v40 = vsel %vm424_vm5, %v417_v21, 920167782  ;;  %v433_v41 = vsel %vm421_vm4, %v411_v20, %v414_v19  ;;  %v2713_v44 = vshrl.u32 %v2549_v23, %v2693_v17 }
  0x9a   :  { %vm422_vm7 = vcmp.lt.s32.totalorder %v402_v9, 2  ;;  %v431_v45 = vsel %vm423_vm6, %v414_v19, %v430_v40  ;;  %v434_v46 = vsel %vm424_vm5, %v420_v32, 1326507024  ;;  %v302_v50 = vshll.u32 %v2548_v5, %v299_v4 }
  0x9b   :  { %v428_v47 = vsel %vm422_vm7, %v425_v36, %v427_v38  ;;  %v432_v48 = vsel %vm422_vm7, %v429_v39, %v431_v45  ;;  %v435_v49 = vsel %vm423_vm6, %v417_v21, %v434_v46  ;;  %v303_v55 = vshrl.u32 %v2544_v59, %v300_v28  ;;  %v1119_v45 = vld [vmem:[%s3528_s3 + $0x10] sm:$0xff] }
  0x9c   :  { %v436_v51 = vsel %vm422_vm7, %v433_v41, %v435_v49  ;;  %v2717_v52 = vmul.u32.u64.low %v2684_v8, %v432_v48  ;;  %v2718_v53 = vmul.u32.u64.high %v2684_v8, %v432_v48, %v2717_v52  ;;  %v305_v60 = vshll.u32 %v2544_v59, %v299_v4 }
  0x9d   :  { %v2723_v56 = vmul.u32.u64.low %v2684_v8, %v436_v51  ;;  %v2724_v57 = vmul.u32.u64.high %v2684_v8, %v436_v51, %v2723_v56  ;;  %v306_v62 = vshrl.u32 %v2546_v63, %v300_v28  ;;  %v304_v0 = vor.u32 %v303_v55, %v302_v50 }
  0x9e   :  { %v308_v2 = vshll.u32 %v2546_v63, %v299_v4  ;;  %v309_v6 = vshrl.u32 %v2545_v61, %v300_v28  ;;  %v311_v7 = vshll.u32 %v2545_v61, %v299_v4  ;;  %v312_v10 = vshrl.u32 %v2547_v1, %v300_v28 }
  0x9f   :  { %v307_v9 = vor.u32 %v306_v62, %v305_v60  ;;  %v314_v11 = vshll.u32 %v2547_v1, %v299_v4  ;;  %v315_v18 = vshrl.u32 %v2549_v23, %v300_v28  ;;  %v444_v19 = vmul.u32 %v2684_v8, %v428_v47  ;;  %v1120_v4 = vld [vmem:[%s3528_s3 + $0x18] sm:$0xff] }
  0xa0   :  { %v447_v20 = vadd.s32 1, %v2718_v53  ;;  %v301_v21 = vshrl.u32 %v2548_v5, %v300_v28  ;;  %v310_v22 = vor.u32 %v309_v6, %v308_v2  ;;  %vm446_vm8 = vc.u32 %v2724_v57, %v2717_v52  ;;  %1138 = vperm.xlu1 %2376, %v1120_v4  }
  0xa1   :  { %v313_v26 = vor.u32 %v312_v10, %v311_v7  ;;  %v316_v29 = vor.u32 %v315_v18, %v314_v11  ;;  %vm317_vm9 = vcmp.lt.s32.totalorder %v2697_v27, 1  ;;  %vm318_vm10 = vcmp.lt.s32.totalorder %v2697_v27, 2  ;;  %v1117_v10 = vld [vmem:[%s3528_s3] sm:$0xff] }
  0xa2   :  { %v448_v32 = vsel %vm446_vm8, %v447_v20, %v2718_v53  ;;  %vm319_vm11 = vcmp.lt.s32.totalorder %v2697_v27, 3  ;;  %vm320_vm12 = vcmp.lt.s32.totalorder %v2697_v27, 4  ;;  %v325_v36 = vsel %vm317_vm9, %v304_v0, %v307_v9 }
  0xa3   :  { %v449_v8 = vadd.s32 %v448_v32, %v444_v19  ;;  %v322_v28 = vsel %vm320_vm12, %v310_v22, 2102212464  ;;  %v326_v37 = vsel %vm320_vm12, %v313_v26, 920167782  ;;  %v321_v38 = vsel %vm317_vm9, %v301_v21, %v304_v0 }
  0xa4   :  { %v327_v39 = vsel %vm319_vm11, %v310_v22, %v326_v37  ;;  %v329_v40 = vsel %vm317_vm9, %v307_v9, %v310_v22  ;;  %v330_v41 = vsel %vm320_vm12, %v316_v29, 1326507024  ;;  %v323_v47 = vsel %vm319_vm11, %v307_v9, %v322_v28  ;;  %1133 = vperm.xlu1 %2376, %v1119_v45  }
  0xa5   :  { %v450_v46 = vadd.s32 536870912, %v449_v8  ;;  %v328_v48 = vsel %vm318_vm10, %v325_v36, %v327_v39  ;;  %v331_v49 = vsel %vm319_vm11, %v313_v26, %v330_v41  ;;  %v207_v50 = vshll.u32 %v2545_v61, %v2675_v58 }
  0xa6   :  { %v332_v51 = vsel %vm318_vm10, %v329_v40, %v331_v49  ;;  %v2763_v53 = vmul.u32.u64.low %v2688_v12, %v328_v48  ;;  %v2764_v55 = vmul.u32.u64.high %v2688_v12, %v328_v48, %v2763_v53  ;;  %v210_v56 = vshll.u32 %v2547_v1, %v2675_v58 }
  0xa7   :  { %v2769_v60 = vshrl.u32 %v450_v46, 30  ;;  %v2772_v62 = vmul.u32.u64.low %v2688_v12, %v332_v51  ;;  %v2773_v0 = vmul.u32.u64.high %v2688_v12, %v332_v51, %v2772_v62  ;;  %v2776_v2 = vshrl.u32 %v2672_v54, 5 }
  0xa8   :  { %v209_v6 = vor.u32 %v2709_v35, %v207_v50  ;;  %v324_v7 = vsel %vm318_vm10, %v321_v38, %v323_v47  ;;  %v199_v9 = vshrl.u32 %v2544_v59, %v2693_v17  ;;  %v212_v11 = vor.u32 %v2713_v44, %v210_v56  ;;  %1123 = vperm.xlu1 %2376, %v1117_v10   ;;  %v1361_v47 = vld [vmem:[%s3532_s7] sm:$0xff] }
  0xa9   :  { %v452_v18 = vshll.u32 %v2769_v60, 30  ;;  %v198_v54 = vshll.u32 %v2548_v5, %v2675_v58  ;;  %v202_v35 = vshrl.u32 %v2546_v63, %v2693_v17  ;;  %v343_v27 = vadd.s32 1, %v2764_v55 }
  0xaa   :  { %v201_v19 = vshll.u32 %v2544_v59, %v2675_v58  ;;  %v204_v20 = vshll.u32 %v2546_v63, %v2675_v58  ;;  %v205_v21 = vshrl.u32 %v2545_v61, %v2693_v17  ;;  %v340_v22 = vmul.u32 %v2688_v12, %v324_v7  ;;  %v1363_v58 = vld [vmem:[%s3532_s7 + $0x10] sm:$0xff] }
  0xab   :  { %v2799_v44 = vsub.s32 %v449_v8, %v452_v18  ;;  %vm342_vm13 = vc.u32 %v2773_v0, %v2763_v53  ;;  %v200_v26 = vor.u32 %v199_v9, %v198_v54  ;;  %vm216_vm14 = vcmp.lt.s32.totalorder %v2776_v2, 4  ;;  %v2314_v54 = vld [vmem:[%s3532_s7 + $0x30] sm:$0xff] }
  0xac   :  { %v344_v29 = vsel %vm342_vm13, %v343_v27, %v2764_v55  ;;  %v203_v32 = vor.u32 %v202_v35, %v201_v19  ;;  %v206_v4 = vor.u32 %v205_v21, %v204_v20  ;;  %v222_v8 = vsel %vm216_vm14, %v209_v6, 920167782  ;;  %1377 = vperm.xlu1 %2376, %v1363_v58  }
  0xad   :  { %v455_v12 = vsub.s32 0, %v2799_v44  ;;  %v345_v28 = vadd.s32 %v344_v29, %v340_v22  ;;  %v226_v36 = vsel %vm216_vm14, %v212_v11, 1326507024  ;;  %v189_v37 = vor.u32 8388608, %v2702_v30 }
  0xae   :  { %vm213_vm15 = vcmp.lt.s32.totalorder %v2776_v2, 1  ;;  %v2817_v38 = vsub.s32 32, %v2705_v31  ;;  %vm215_vm0 = vcmp.lt.s32.totalorder %v2776_v2, 3  ;;  %v197_v45 = vshrl.u32 %v2548_v5, %v2693_v17 }
  0xaf   :  { %v2273_v39 = vmin.u32 %v455_v12, %v2799_v44  ;;  %v221_v40 = vsel %vm213_vm15, %v200_v26, %v203_v32  ;;  %v346_v41 = vadd.s32 536870912, %v345_v28  ;;  %v223_v30 = vsel %vm215_vm0, %v206_v4, %v222_v8 }
  0xb0   :  { %v225_v46 = vsel %vm213_vm15, %v203_v32, %v206_v4  ;;  %vm214_vm1 = vcmp.lt.s32.totalorder %v2776_v2, 2  ;;  %v218_v49 = vsel %vm216_vm14, %v206_v4, 2102212464  ;;  %v227_v50 = vsel %vm215_vm0, %v209_v6, %v226_v36  ;;  %1367 = vperm.xlu1 %2376, %v1361_v47  }
  0xb1   :  { %v457_v48 = vclz %v2273_v39  ;;  %v2837_v17 = vshrl.u32 %v346_v41, 30  ;;  %v224_v51 = vsel %vm214_vm1, %v221_v40, %v223_v30  ;;  %v228_v55 = vsel %vm214_vm1, %v225_v46, %v227_v50  ;;  %v2326_v30 = vld [vmem:[%s3532_s7 + $0x50] sm:$0xff] }
  0xb2   :  { %v229_v56 = vshll.u32 %v189_v37, 8  ;;  %v2844_v62 = vshrl.u32 %v2690_v13, 5  ;;  %v104_v7 = vshrl.u32 %v2547_v1, %v2817_v38  ;;  %v217_v6 = vsel %vm213_vm15, %v197_v45, %v200_v26 }
  0xb3   :  { %v2274_v9 = vadd.s32 4294967294, %v457_v48  ;;  %v348_v10 = vshll.u32 %v2837_v17, 30  ;;  %v219_v13 = vsel %vm215_vm0, %v203_v32, %v218_v49  ;;  %v103_v19 = vshll.u32 %v2545_v61, %v2705_v31 }
  0xb4   :  { %v2851_v11 = vmul.u32.u64.low %v229_v56, %v228_v55  ;;  %v2852_v18 = vmul.u32.u64.high %v229_v56, %v228_v55, %v2851_v11  ;;  %v2859_v35 = vmul.u32.u64.low %v229_v56, %v224_v51  ;;  %v2860_v27 = vmul.u32.u64.high %v229_v56, %v224_v51, %v2859_v35  ;;  %1502 = vperm.xlu1 %2376, %v2314_v54  }
  0xb5   :  { %vm2275_vm2 = vcmp.lt.s32.totalorder %v2274_v9, 0  ;;  %v107_v20 = vshrl.u32 %v2549_v23, %v2817_v38  ;;  %v2867_v22 = vsub.s32 %v345_v28, %v348_v10  ;;  %v106_v26 = vshll.u32 %v2547_v1, %v2705_v31  ;;  %v2312_v28 = vld [vmem:[%s3532_s7 + $0x20] sm:$0xff] }
  0xb6   :  { %v460_v21 = vsel %vm2275_vm2, 0, %v2274_v9  ;;  %v445_v29 = vadd.s32 %v2717_v52, %v2724_v57  ;;  %v2873_v58 = vor.u32 %v104_v7, %v103_v19  ;;  %v220_v23 = vsel %vm214_vm1, %v217_v6, %v219_v13 }
  0xb7   :  { %v461_v32 = vsub.s32 32, %v460_v21  ;;  %v465_v4 = vsub.s32 4294967266, %v460_v21  ;;  %v462_v8 = vshll.u32 %v2799_v44, %v460_v21  ;;  %v351_v12 = vsub.s32 0, %v2867_v22 }
  0xb8   :  { %vm238_vm3 = vc.u32 %v2852_v18, %v2859_v35  ;;  %v239_v52 = vadd.s32 1, %v2860_v27  ;;  %v108_v57 = vor.u32 %v107_v20, %v106_v26  ;;  %v475_v37 = vsub.s32 4, %v2769_v60  ;;  %1492 = vperm.xlu1 %2376, %v2312_v28   ;;  %v2338_v28 = vld [vmem:[%s3532_s7 + $0x70] sm:$0xff] }
  0xb9   :  { %v463_v1 = vshrl.u32 %v445_v29, %v461_v32  ;;  %v466_v36 = vadd.s32 127, %v465_v4  ;;  %v2269_v44 = vmin.u32 %v351_v12, %v2867_v22  ;;  %v236_v2 = vmul.u32 %v229_v56, %v220_v23 }
  0xba   :  { %v240_v41 = vsel %vm238_vm3, %v239_v52, %v2860_v27  ;;  %vm112_vm4 = vcmp.lt.s32.totalorder %v2844_v62, 4  ;;  %vm391_vm5 = vcmp.lt.s32.totalorder %v2656_v25, 0  ;;  %vm2898_vm6 = vcmp.le.f32.partialorder %v389_v42, 0.7853982 }
  0xbb   :  { %v464_v39 = vor.u32 %v463_v1, %v462_v8  ;;  %v467_v40 = vshll.u32 %v466_v36, 23  ;;  %v353_v45 = vclz %v2269_v44  ;;  %v118_v46 = vsel %vm112_vm4, %v2873_v58, 920167782 }
  0xbc   :  { %v241_v49 = vadd.s32 %v240_v41, %v236_v2  ;;  %v122_v50 = vsel %vm112_vm4, %v108_v57, 1326507024  ;;  %v476_v51 = vsel %vm391_vm5, %v475_v37, %v2769_v60  ;;  %v341_v55 = vadd.s32 %v2763_v53, %v2773_v0  ;;  %1721 = vperm.xlu1 %2376, %v2326_v30   ;;  %v2324_v53 = vld [vmem:[%s3532_s7 + $0x40] sm:$0xff] }
  0xbd   :  { %v468_v48 = vor.u32 4788187, %v467_v40  ;;  %v2270_v56 = vadd.s32 4294967294, %v353_v45  ;;  %v471_v9 = vcvt.s32.f32 %v464_v39  ;;  %v77_v42 = vand.u32 2147483647, %v2660_v33  ;;  %v2336_v39 = vld [vmem:[%s3532_s7 + $0x60] sm:$0xff] }
  0xbe   :  { %v242_v10 = vadd.s32 536870912, %v241_v49  ;;  %v95_v6 = vshrl.u32 %v2544_v59, %v2817_v38  ;;  %v100_v11 = vshll.u32 %v2546_v63, %v2705_v31  ;;  %v101_v60 = vshrl.u32 %v2545_v61, %v2817_v38 }
  0xbf   :  { %v469_v7 = vand.u32 2147483647, %v468_v48  ;;  %vm2271_vm7 = vcmp.lt.s32.totalorder %v2270_v56, 0  ;;  %v98_v27 = vshrl.u32 %v2546_v63, %v2817_v38  ;;  %v94_v21 = vshll.u32 %v2548_v5, %v2705_v31 }
  0xc0   :  { %v356_v54 = vsel %vm2271_vm7, 0, %v2270_v56  ;;  %v2919_v13 = vshrl.u32 %v242_v10, 30  ;;  %v102_v26 = vor.u32 %v101_v60, %v100_v11  ;;  %v84_v32 = vand.u32 8388607, %v77_v42  ;;  %1711 = vperm.xlu1 %2376, %v2324_v53  }
  0xc1   :  { %v472_v0 = vmul.f32 %v471_v9, %v469_v7  ;;  %v357_v19 = vsub.s32 32, %v356_v54  ;;  %v361_v20 = vsub.s32 4294967266, %v356_v54  ;;  %v97_v4 = vshll.u32 %v2544_v59, %v2705_v31 }
  0xc2   :  { %v244_v61 = vshll.u32 %v2919_v13, 30  ;;  %v358_v8 = vshll.u32 %v2867_v22, %v356_v54  ;;  %v93_v23 = vshrl.u32 %v2548_v5, %v2817_v38  ;;  %v96_v52 = vor.u32 %v95_v6, %v94_v21 }
  0xc3   :  { %v473_v29 = vxor.u32 2147483648, %v472_v0  ;;  %v359_v12 = vshrl.u32 %v341_v55, %v357_v19  ;;  %v362_v63 = vadd.s32 127, %v361_v20  ;;  %v99_v57 = vor.u32 %v98_v27, %v97_v4 }
  0xc4   :  { %v2938_v36 = vsub.s32 %v241_v49, %v244_v61  ;;  %v114_v5 = vsel %vm112_vm4, %v102_v26, 2102212464  ;;  %v85_v37 = vor.u32 8388608, %v84_v32  ;;  %vm109_vm8 = vcmp.lt.s32.totalorder %v2844_v62, 1  ;;  %1940 = vperm.xlu1 %2376, %v2338_v28  }
  0xc5   :  { %v474_v1 = vsel %vm391_vm5, %v473_v29, %v472_v0  ;;  %v360_v31 = vor.u32 %v359_v12, %v358_v8  ;;  %v363_v22 = vshll.u32 %v362_v63, 23  ;;  %vm110_vm9 = vcmp.lt.s32.totalorder %v2844_v62, 2 }
  0xc6   :  { %v477_v59 = vsel %vm2898_vm6, %v2656_v25, %v474_v1  ;;  %v247_v38 = vsub.s32 0, %v2938_v36  ;;  %vm111_vm10 = vcmp.lt.s32.totalorder %v2844_v62, 3  ;;  %v113_v41 = vsel %vm109_vm8, %v93_v23, %v96_v52 }
  0xc7   :  { %2377 = vcosq.f32 %v477_v59  ;;  %v364_v44 = vor.u32 4788187, %v363_v22  ;;  %v367_v40 = vcvt.s32.f32 %v360_v31  ;;  %v115_v45 = vsel %vm111_vm10, %v99_v57, %v114_v5 }
  0xc8   :  { %2379 = vsinq.f32 %v477_v59  ;;  %v2265_v2 = vmin.u32 %v247_v38, %v2938_v36  ;;  %v117_v48 = vsel %vm109_vm8, %v96_v52, %v99_v57  ;;  %v119_v49 = vsel %vm111_vm10, %v102_v26, %v118_v46  ;;  %1930 = vperm.xlu1 %2376, %v2336_v39  }
  0xc9   :  { %v365_v30 = vand.u32 2147483647, %v364_v44  ;;  %v121_v55 = vsel %vm109_vm8, %v99_v57, %v102_v26  ;;  %v120_v7 = vsel %vm110_vm9, %v117_v48, %v119_v49  ;;  %v123_v9 = vsel %vm111_vm10, %v2873_v58, %v122_v50 }
  0xca   :  { %v249_v56 = vclz %v2265_v2  ;;  %v125_v10 = vshll.u32 %v85_v37, 8  ;;  %v478_v6 = vsel %vm2898_vm6, 0, %v476_v51  ;;  %v124_v60 = vsel %vm110_vm9, %v121_v55, %v123_v9 }
  0xcb   :  { %v368_v11 = vmul.f32 %v367_v40, %v365_v30  ;;  %vm2962_vm11 = vcmp.le.f32.partialorder %v285_v43, 0.7853982  ;;  %v2550_v58 = vmov 0.0   ;;  %v116_v50 = vsel %vm110_vm9, %v113_v41, %v115_v45 }
  0xcc   :  { %v2266_v53 = vadd.s32 4294967294, %v249_v56  ;;  %v2966_v0 = vmul.u32.u64.low %v125_v10, %v124_v60  ;;  %v2967_v54 = vmul.u32.u64.high %v125_v10, %v124_v60, %v2966_v0  ;;  %1003 = vmatprep.mubr.f32.mxu1 %v2550_v58  ;;  %991 = vmatprep.mubr.f32.mxu0 %v2550_v58  ;;  %v895_v43 = vand.u32 3, %v478_v6 }
  0xcd   :  { %v369_v47 = vxor.u32 2147483648, %v368_v11  ;;  %v2973_v51 = vmul.u32.u64.low %v125_v10, %v120_v7  ;;  %v2974_v27 = vmul.u32.u64.high %v125_v10, %v120_v7, %v2973_v51  ;;  %vm287_vm12 = vcmp.lt.s32.totalorder %v2654_v24, 0 }
  0xce   :  { %vm2267_vm13 = vcmp.lt.s32.totalorder %v2266_v53, 0  ;;  %v482_v19 = vadd.s32 3, %v478_v6  ;;  %v371_v21 = vsub.s32 4, %v2837_v17  ;;  %v237_v26 = vadd.s32 %v2859_v35, %v2852_v18 }
  0xcf   :  { %v370_v20 = vsel %vm287_vm12, %v369_v47, %v368_v11  ;;  %v252_v29 = vsel %vm2267_vm13, 0, %v2266_v53  ;;  %vm481_vm14 = vweird.f32 %v2656_v25  ;;  %v132_v4 = vmul.u32 %v125_v10, %v116_v50  ;;  %v2295_v25 = vld [vmem:[%s3527_s2 + $0x38] sm:$0xff] }
  0xd0   :  { %v373_v62 = vsel %vm2962_vm11, %v2654_v24, %v370_v20  ;;  %v253_v61 = vsub.s32 32, %v252_v29  ;;  %v257_v32 = vsub.s32 4294967266, %v252_v29  ;;  %v254_v8 = vshll.u32 %v2938_v36, %v252_v29 }
  0xd1   :  { %2381 = vcosq.f32 %v373_v62  ;;  %vm134_vm15 = vc.u32 %v2967_v54, %v2973_v51  ;;  %v135_v12 = vadd.s32 1, %v2974_v27  ;;  %v483_v63 = vand.u32 3, %v482_v19 }
  0xd2   :  { %2383 = vsinq.f32 %v373_v62  ;;  %v255_v18 = vshrl.u32 %v237_v26, %v253_v61  ;;  %v258_v35 = vadd.s32 127, %v257_v32  ;;  %vm896_vm0 = vcmp.lt.s32.totalorder %v895_v43, 2 }
  0xd3   :  { %vm897_vm1 = vcmp.eq.s32.totalorder %v895_v43, 0  ;;  %vm900_vm2 = vcmp.eq.s32.totalorder %v895_v43, 2  ;;  %v136_v28 = vsel %vm134_vm15, %v135_v12, %v2974_v27  ;;  %v372_v22 = vsel %vm287_vm12, %v371_v21, %v2837_v17 }
  0xd4   :  { %v2378_v23 = vpop.eup %2377  ;;  %v256_v57 = vor.u32 %v255_v18, %v254_v8  ;;  %v259_v59 = vshll.u32 %v258_v35, 23  ;;  %v137_v36 = vadd.s32 %v136_v28, %v132_v4  ;;  %vm484_vm3 = vcmp.lt.s32.totalorder %v483_v63, 2 }
  0xd5   :  { %v2380_v1 = vpop.eup %2379  ;;  %v489_v52 = vxor.u32 2147483648, %v2378_v23  ;;  %vm485_vm4 = vcmp.eq.s32.totalorder %v483_v63, 0  ;;  %vm488_vm5 = vcmp.eq.s32.totalorder %v483_v63, 2  ;;  %v3005_v49 = vsel %vm2962_vm11, 0, %v372_v22 }
  0xd6   :  { %v486_v31 = vxor.u32 2147483648, %v2380_v1  ;;  %v260_v38 = vor.u32 4788187, %v259_v59  ;;  %v138_v37 = vadd.s32 536870912, %v137_v36  ;;  %v263_v39 = vcvt.s32.f32 %v256_v57 }
  0xd7   :  { %v902_v5 = vsel %vm900_vm2, %v489_v52, %v2380_v1  ;;  %v490_v2 = vsel %vm488_vm5, %v489_v52, %v2380_v1  ;;  %v792_v7 = vand.u32 3, %v3005_v49  ;;  %vm183_vm6 = vcmp.lt.s32.totalorder %v2662_v34, 0 }
  0xd8   :  { %v899_v44 = vsel %vm897_vm1, %v2378_v23, %v486_v31  ;;  %v487_v40 = vsel %vm485_vm4, %v2378_v23, %v486_v31  ;;  %v261_v45 = vand.u32 2147483647, %v260_v38  ;;  %v2997_v30 = vshrl.u32 %v138_v37, 30 }
  0xd9   :  { %v903_v41 = vsel %vm896_vm0, %v899_v44, %v902_v5  ;;  %v2999_v48 = vsel %vm484_vm3, %v487_v40, %v490_v2  ;;  %vm3014_vm7 = vcmp.le.f32.partialorder %v181_v3, 0.7853982  ;;  %vm797_vm8 = vcmp.eq.s32.totalorder %v792_v7, 2 }
  0xda   :  { %v904_v17 = vsel %vm481_vm14, nan, %v903_v41  ;;  %v264_v55 = vmul.f32 %v263_v39, %v261_v45  ;;  %v140_v56 = vshll.u32 %v2997_v30, 30  ;;  %vm794_vm9 = vcmp.eq.s32.totalorder %v792_v7, 0 }
  0xdb   :  { %955 = vmatprep.subr.mxu0 %v904_v17  ;;  %2345 = vmatprep.subr.mxu1 %v904_v17  ;;  %v267_v43 = vsub.s32 4, %v2919_v13  ;;  %vm793_vm10 = vcmp.lt.s32.totalorder %v792_v7, 2  ;;  %vm377_vm11 = vweird.f32 %v2654_v24  ;;  %v133_v4 = vadd.s32 %v2973_v51, %v2967_v54  ;;  %v2293_v24 = vld [vmem:[%s3527_s2 + $0x28] sm:$0xff] }
  0xdc   :  { %v265_v9 = vxor.u32 2147483648, %v264_v55  ;;  %v141_v10 = vsub.s32 %v137_v36, %v140_v56  ;;  %vm273_vm1 = vweird.f32 %v2662_v34  ;;  %vm79_vm2 = vcmp.lt.s32.totalorder %v2660_v33, 0 }
  0xdd   :  { %v268_v62 = vsel %vm183_vm6, %v267_v43, %v2919_v13  ;;  %v163_v39 = vsub.s32 4, %v2997_v30  ;;  %vm78_vm3 = vcmp.le.f32.partialorder %v77_v42, 0.7853982  ;;  %v378_v45 = vadd.s32 3, %v3005_v49 }
  0xde   :  { %v3010_v6 = vpop.eup %2381  ;;  %v266_v60 = vsel %vm183_vm6, %v265_v9, %v264_v55  ;;  %v143_v46 = vsub.s32 0, %v141_v10  ;;  %v270_v32 = vsel %vm3014_vm7, 0, %v268_v62 }
  0xdf   :  { %v3020_v53 = vpop.eup %2383  ;;  %v385_v0 = vxor.u32 2147483648, %v3010_v6  ;;  %v269_v47 = vsel %vm3014_vm7, %v2662_v34, %v266_v60  ;;  %v689_v23 = vand.u32 3, %v270_v32  ;;  %v164_v41 = vsel %vm79_vm2, %v163_v39, %v2997_v30  ;;  %v905_v34 = vld [vmem:[%s3527_s2] sm:$0xff] }
  0xe0   :  { %v382_v50 = vxor.u32 2147483648, %v3020_v53  ;;  %2385 = vcosq.f32 %v269_v47  ;;  %v2261_v3 = vmin.u32 %v143_v46, %v141_v10  ;;  %v166_v17 = vsel %vm78_vm3, 0, %v164_v41 }
  0xe1   :  { %v799_v27 = vsel %vm797_vm8, %v385_v0, %v3020_v53  ;;  %2387 = vsinq.f32 %v269_v47  ;;  %vm694_vm13 = vcmp.eq.s32.totalorder %v689_v23, 2  ;;  %vm691_vm15 = vcmp.eq.s32.totalorder %v689_v23, 0 }
  0xe2   :  { %v796_v19 = vsel %vm794_vm9, %v3010_v6, %v382_v50  ;;  %v145_v20 = vclz %v2261_v3  ;;  %vm690_vm0 = vcmp.lt.s32.totalorder %v689_v23, 2  ;;  %v274_v55 = vadd.s32 3, %v270_v32  ;;  %v40_v23 = vld [vmem:[%s3525_s0 + $0x10] sm:$0xff] }
  0xe3   :  { %v800_v21 = vsel %vm793_vm10, %v796_v19, %v799_v27  ;;  %v170_v56 = vadd.s32 3, %v166_v17  ;;  %v379_v7 = vand.u32 3, %v378_v45  ;;  %vm169_vm7 = vweird.f32 %v2660_v33 }
  0xe4   :  { %v801_v26 = vsel %vm377_vm11, nan, %v800_v21  ;;  %v2262_v29 = vadd.s32 4294967294, %v145_v20  ;;  %v275_v9 = vand.u32 3, %v274_v55 }
  0xe5   :  { %956 = vmatpush1.msra.mxu0 %v801_v26  ;;  %2347 = vmatpush1.msra.mxu1 %v801_v26  ;;  %v171_v11 = vand.u32 3, %v170_v56  ;;  %vm380_vm4 = vcmp.lt.s32.totalorder %v379_v7, 2  ;;  %vm381_vm5 = vcmp.eq.s32.totalorder %v379_v7, 0  ;;  %vm384_vm6 = vcmp.eq.s32.totalorder %v379_v7, 2 }
  0xe6   :  { %vm2263_vm12 = vcmp.lt.s32.totalorder %v2262_v29, 0  ;;  %vm277_vm8 = vcmp.eq.s32.totalorder %v275_v9, 0  ;;  %v386_v30 = vsel %vm384_vm6, %v385_v0, %v3020_v53  ;;  %vm280_vm10 = vcmp.eq.s32.totalorder %v275_v9, 2  ;;  %v2294_v53 = vld [vmem:[%s3527_s2 + $0x30] sm:$0xff] }
  0xe7   :  { %v148_v61 = vsel %vm2263_vm12, 0, %v2262_v29  ;;  %v383_v46 = vsel %vm381_vm5, %v3010_v6, %v382_v50  ;;  %vm172_vm5 = vcmp.lt.s32.totalorder %v171_v11, 2  ;;  %v492_v29 = vsel %vm481_vm14, nan, %v2999_v48 }
  0xe8   :  { %v149_v8 = vsub.s32 32, %v148_v61  ;;  %v153_v12 = vsub.s32 4294967266, %v148_v61  ;;  %v150_v18 = vshll.u32 %v141_v10, %v148_v61  ;;  %v586_v10 = vand.u32 3, %v166_v17  ;;  %v2292_v61 = vld [vmem:[%s3527_s2 + $0x20] sm:$0xff] }
  0xe9   :  { %v387_v0 = vsel %vm380_vm4, %v383_v46, %v386_v30  ;;  %vm1259_vm14 = vcmask 195584  }
  0xea   :  { %v151_v35 = vshrl.u32 %v133_v4, %v149_v8  ;;  %v154_v63 = vadd.s32 127, %v153_v12  ;;  %vm588_vm9 = vcmp.eq.s32.totalorder %v586_v10, 0  ;;  %vm591_vm12 = vcmp.eq.s32.totalorder %v586_v10, 2  ;;  %v907_v8 = vld [vmem:[%s3527_s2 + $0x10] sm:$0xff]  ;;  %v908_v12 = vld [vmem:[%s3527_s2 + $0x18] sm:$0xff] }
  0xeb   :  { %v388_v32 = vsel %vm377_vm11, nan, %v387_v0  ;;  %vm1157_vm11 = vcmask 261120  }
  0xec   :  { %v152_v28 = vor.u32 %v151_v35, %v150_v18  ;;  %v155_v1 = vshll.u32 %v154_v63, 23  ;;  %v43_v18 = vld [vmem:[%s3525_s0 + $0x28] sm:$0xff]  ;;  %v42_v35 = vld [vmem:[%s3525_s0 + $0x20] sm:$0xff]  ;;  %v41_v63 = vld [vmem:[%s3525_s0 + $0x18] sm:$0xff] }
  0xed   :  { %v2386_v52 = vpop.eup %2385 }
  0xee   :  { %v2388_v57 = vpop.eup %2387  ;;  %v281_v59 = vxor.u32 2147483648, %v2386_v52  ;;  %v156_v13 = vor.u32 4788187, %v155_v1  ;;  %v159_v5 = vcvt.s32.f32 %v152_v28  ;;  %v39_v28 = vld [vmem:[%s3525_s0 + $0x8] sm:$0xff]  ;;  %v38_v1 = vld [vmem:[%s3525_s0] sm:$0xff] }
  0xef   :  { %v278_v36 = vxor.u32 2147483648, %v2388_v57 }
  0xf0   :  { %v696_v31 = vsel %vm694_vm13, %v281_v59, %v2388_v57  ;;  %v157_v22 = vand.u32 2147483647, %v156_v13  ;;  %vm173_vm13 = vcmp.eq.s32.totalorder %v171_v11, 0  ;;  %v282_v43 = vsel %vm280_vm10, %v281_v59, %v2388_v57  ;;  %v1150_v57 = vld [vmem:[%s3529_s4 + $0x8] sm:$0xff]  ;;  %v1151_v59 = vld [vmem:[%s3529_s4 + $0x10] sm:$0xff]  ;;  %v1152_v13 = vld [vmem:[%s3529_s4 + $0x18] sm:$0xff] }
  0xf1   :  { %v693_v54 = vsel %vm691_vm15, %v2386_v52, %v278_v36  ;;  %v279_v27 = vsel %vm277_vm8, %v2386_v52, %v278_v36  ;;  %vm176_vm15 = vcmp.eq.s32.totalorder %v171_v11, 2  ;;  %v1149_v52 = vld [vmem:[%s3529_s4] sm:$0xff] }
  0xf2   :  { %v697_v51 = vsel %vm690_vm0, %v693_v54, %v696_v31  ;;  %v160_v38 = vmul.f32 %v159_v5, %v157_v22  ;;  %vm587_vm0 = vcmp.lt.s32.totalorder %v586_v10, 2 }
  0xf3   :  { %v698_v37 = vsel %vm273_vm1, nan, %v697_v51 }
  0xf4   :  { %957 = vmatprep.subr.mxu0 %v698_v37  ;;  %2346 = vmatprep.subr.mxu1 %v698_v37  ;;  %v161_v44 = vxor.u32 2147483648, %v160_v38 }
  0xf6   :  { %v162_v40 = vsel %vm79_vm2, %v161_v44, %v160_v38  ;;  %vm914_vm2 = vcmask 130048  }
  0xf7   :  { %v165_v2 = vsel %vm78_vm3, %v2660_v33, %v162_v40  ;;  %vm276_vm3 = vcmp.lt.s32.totalorder %v275_v9, 2  ;;  %v906_v33 = vld [vmem:[%s3527_s2 + $0x8] sm:$0xff] }
  0xf8   :  { %2389 = vcosq.f32 %v165_v2  ;;  %v283_v50 = vsel %vm276_vm3, %v279_v27, %v282_v43  ;;  %v1129_v27 = vpop.permute.xlu0 %1128 }
  0xf9   :  { %2391 = vsinq.f32 %v165_v2  ;;  %v284_v4 = vsel %vm273_vm1, nan, %v283_v50  ;;  %v1154_v50 = vld [vmem:[%s3530_s5 + $0x8] sm:$0xff] }
 0x105   :  { %v2390_v60 = vpop.eup %2389 }
 0x106   :  { %v2392_v42 = vpop.eup %2391  ;;  %v177_v49 = vxor.u32 2147483648, %v2390_v60 }
 0x107   :  { %v174_v47 = vxor.u32 2147483648, %v2392_v42 }
 0x108   :  { %v593_v3 = vsel %vm591_vm12, %v177_v49, %v2392_v42  ;;  %v178_v21 = vsel %vm176_vm15, %v177_v49, %v2392_v42 }
 0x109   :  { %v590_v19 = vsel %vm588_vm9, %v2390_v60, %v174_v47  ;;  %v175_v20 = vsel %vm173_vm13, %v2390_v60, %v174_v47 }
 0x10a   :  { %v594_v26 = vsel %vm587_vm0, %v590_v19, %v593_v3  ;;  %v179_v62 = vsel %vm172_vm5, %v175_v20, %v178_v21 }
 0x10b   :  { %v595_v6 = vsel %vm169_vm7, nan, %v594_v26  ;;  %v180_v48 = vsel %vm169_vm7, nan, %v179_v62  ;;  %v1156_v62 = vld [vmem:[%s3530_s5 + $0x18] sm:$0xff] }
 0x10c   :  { %958 = vmatpush1.msra.mxu0 %v595_v6  ;;  %2348 = vmatpush1.msra.mxu1 %v595_v6  ;;  %v1153_v6 = vld [vmem:[%s3530_s5] sm:$0xff] }
 0x10d   :  { %2298 = vmatmul.mubr.msk.f32.vlgmr.msra.gmra.mxu1 %vm914_vm2, %v2294_v53  ;;  %1056 = vmatprep.subr.mxu1 %v492_v29  ;;  %v1155_v29 = vld [vmem:[%s3530_s5 + $0x10] sm:$0xff] }
 0x10e   :  { %1057 = vmatpush1.msra.mxu1 %v388_v32  ;;  %1009 = vmatprep.mubr.f32.mxu1 %v2550_v58 }
 0x10f   :  { %1058 = vmatprep.subr.mxu1 %v284_v4  ;;  %2296 = vmatmul.mubr.msk.f32.vlgmr.msra.gmra.mxu0 %vm914_vm2, %v2292_v61 }
 0x110   :  { %1059 = vmatpush1.msra.mxu1 %v180_v48  ;;  %997 = vmatprep.mubr.f32.mxu0 %v2550_v58 }
 0x111   :  { %2299 = vmatmul.mubr.msk.f32.gmra.mxu1 %vm914_vm2, %v2295_v25  ;;  %1298 = vmatprep.subr.mxu1 %v43_v18 }
 0x112   :  { %1092 = vmatprep.mubr.f32.mxu1 %v2550_v58 }
 0x113   :  { %2297 = vmatmul.mubr.msk.f32.gmra.mxu0 %vm914_vm2, %v2293_v24  ;;  %v1383_v24 = vpop.permute.xlu0 %1382 }
 0x114   :  { %1234 = vmatprep.mubr.f32.mxu0 %v2550_v58 }
 0x115   :  { %2300 = vmatmul.mubr.msk.f32.vlgmr.msra.gmra.mxu1 %vm914_vm2, %v905_v34 }
 0x116   :  { %1098 = vmatprep.mubr.f32.mxu1 %v2550_v58  ;;  %1299 = vmatpush1.msra.mxu1 %v42_v35 }
 0x117   :  { %1300 = vmatprep.subr.mxu1 %v41_v63 }
 0x118   :  { %1301 = vmatpush1.msra.mxu1 %v40_v23 }
 0x119   :  { %2301 = vmatmul.mubr.msk.f32.gmra.mxu1 %vm914_vm2, %v906_v33  ;;  %1302 = vmatprep.subr.mxu1 %v39_v28  ;;  %v1373_v28 = vpop.permute.xlu0 %1372 }
 0x11a   :  { %1104 = vmatprep.mubr.f32.mxu1 %v2550_v58  ;;  %1303 = vmatpush1.msra.mxu1 %v38_v1 }
 0x11b   :  { %v1139_v2 = vpop.permute.xlu1 %1138 }
 0x11d   :  { %2302 = vmatmul.mubr.msk.f32.gmra.mxu1 %vm914_vm2, %v907_v8 }
 0x11e   :  { %1110 = vmatprep.mubr.f32.mxu1 %v2550_v58 }
 0x11f   :  { %v1134_v11 = vpop.permute.xlu1 %1133 }
 0x121   :  { %2303 = vmatmul.mubr.msk.f32.gmra.mxu1 %vm914_vm2, %v908_v12 }
 0x122   :  { %1336 = vmatprep.mubr.f32.mxu1 %v2550_v58 }
 0x123   :  { %v1124_v21 = vpop.permute.xlu1 %1123 }
 0x125   :  { %2308 = vmatmul.mubr.msk.f32.vlgmr.msra.gmra.mxu1 %vm1259_vm14, %v1149_v52 }
 0x126   :  { %1342 = vmatprep.mubr.f32.mxu1 %v2550_v58 }
 0x127   :  { %v1378_v25 = vpop.permute.xlu1 %1377 }
 0x129   :  { %2309 = vmatmul.mubr.msk.f32.gmra.mxu1 %vm1259_vm14, %v1150_v57 }
 0x12a   :  { %1348 = vmatprep.mubr.f32.mxu1 %v2550_v58 }
 0x12b   :  { %v1368_v33 = vpop.permute.xlu1 %1367 }
 0x12d   :  { %2310 = vmatmul.mubr.msk.f32.gmra.mxu1 %vm1259_vm14, %v1151_v59 }
 0x12e   :  { %1354 = vmatprep.mubr.f32.mxu1 %v2550_v58 }
 0x131   :  { %2311 = vmatmul.mubr.msk.f32.gmra.mxu1 %vm1259_vm14, %v1152_v13 }
 0x132   :  { %1805 = vmatprep.mubr.f32.mxu1 %v2550_v58 }
 0x1cd   :  { %v1005_v36 = vpop.f32.mrf.mxu1 }
 0x1cf   :  { %v1007_v31 = vpop.f32.mrf.mxu1  ;;  %v993_v51 = vpop.f32.mrf.mxu0 }
 0x1d1   :  { %v1011_v22 = vpop.f32.mrf.mxu1  ;;  %v995_v44 = vpop.f32.mrf.mxu0 }
 0x1d3   :  { %v1013_v5 = vpop.f32.mrf.mxu1  ;;  %v999_v41 = vpop.f32.mrf.mxu0 }
 0x1d5   :  { %v1094_v54 = vpop.f32.mrf.mxu1  ;;  %v1001_v55 = vpop.f32.mrf.mxu0 }
 0x1d6   :  { %v1095_v43 = vadd.f32 %v1094_v54, %v993_v51 }
 0x1d7   :  { %v1096_v38 = vpop.f32.mrf.mxu1 }
 0x1d8   :  { %v1097_v47 = vadd.f32 %v1096_v38, %v995_v44  ;;  %v1141_v53 = vadd.f32 %v1124_v21, %v1095_v43 }
 0x1d9   :  { %v1100_v37 = vpop.f32.mrf.mxu1 }
 0x1da   :  { %v1101_v49 = vadd.f32 %v1100_v37, %v999_v41  ;;  %v1142_v26 = vadd.f32 %v1124_v21, %v1097_v47 }
 0x1db   :  { %v1102_v39 = vpop.f32.mrf.mxu1 }
 0x1dc   :  { %v1103_v42 = vadd.f32 %v1102_v39, %v1001_v55  ;;  %v1143_v0 = vadd.f32 %v1129_v27, %v1101_v49 }
 0x1dd   :  { %v1106_v40 = vpop.f32.mrf.mxu1 }
 0x1de   :  { %v1107_v60 = vadd.f32 %v1106_v40, %v1005_v36  ;;  %v1144_v20 = vadd.f32 %v1129_v27, %v1103_v42 }
 0x1df   :  { %v1108_v45 = vpop.f32.mrf.mxu1 }
 0x1e0   :  { %v1109_v9 = vadd.f32 %v1108_v45, %v1007_v31  ;;  %v1145_v19 = vadd.f32 %v1134_v11, %v1107_v60 }
 0x1e1   :  { %v1112_v17 = vpop.f32.mrf.mxu1 }
 0x1e2   :  { %v1113_v56 = vadd.f32 %v1112_v17, %v1011_v22  ;;  %v1146_v3 = vadd.f32 %v1134_v11, %v1109_v9 }
 0x1e3   :  { %v1114_v7 = vpop.f32.mrf.mxu1 }
 0x1e4   :  { %v1115_v10 = vadd.f32 %v1114_v7, %v1013_v5  ;;  %v1147_v46 = vadd.f32 %v1139_v2, %v1113_v56 }
 0x1e5   :  { %v1338_v61 = vpop.f32.mrf.mxu1 }
 0x1e6   :  { %v1148_v30 = vadd.f32 %v1139_v2, %v1115_v10 }
 0x1e7   :  { %v1340_v32 = vpop.f32.mrf.mxu1 }
 0x1e8   :  { %1194 = vmatprep.subr.mxu0 %v1148_v30 }
 0x1e9   :  { %1195 = vmatpush1.msra.mxu0 %v1147_v46  ;;  %v1344_v4 = vpop.f32.mrf.mxu1 }
 0x1ea   :  { %1196 = vmatprep.subr.mxu0 %v1146_v3 }
 0x1eb   :  { %1197 = vmatpush1.msra.mxu0 %v1145_v19  ;;  %v1346_v48 = vpop.f32.mrf.mxu1 }
 0x1ec   :  { %1198 = vmatprep.subr.mxu0 %v1144_v20 }
 0x1ed   :  { %1199 = vmatpush1.msra.mxu0 %v1143_v0  ;;  %v1350_v18 = vpop.f32.mrf.mxu1 }
 0x1ee   :  { %1200 = vmatprep.subr.mxu0 %v1142_v26 }
 0x1ef   :  { %1201 = vmatpush1.msra.mxu0 %v1141_v53  ;;  %v1352_v13 = vpop.f32.mrf.mxu1 }
 0x1f0   :  { %2304 = vmatmul.mubr.msk.f32.vlgmr.msra.gmra.mxu0 %vm1157_vm11, %v1153_v6 }
 0x1f1   :  { %1240 = vmatprep.mubr.f32.mxu0 %v2550_v58  ;;  %v1356_v39 = vpop.f32.mrf.mxu1 }
 0x1f3   :  { %v1358_v42 = vpop.f32.mrf.mxu1 }
 0x1f4   :  { %2305 = vmatmul.mubr.msk.f32.gmra.mxu0 %vm1157_vm11, %v1154_v50 }
 0x1f5   :  { %1246 = vmatprep.mubr.f32.mxu0 %v2550_v58 }
 0x1f8   :  { %2306 = vmatmul.mubr.msk.f32.gmra.mxu0 %vm1157_vm11, %v1155_v29 }
 0x1f9   :  { %1252 = vmatprep.mubr.f32.mxu0 %v2550_v58 }
 0x1fc   :  { %2307 = vmatmul.mubr.msk.f32.gmra.mxu0 %vm1157_vm11, %v1156_v62 }
 0x1fd   :  { %1586 = vmatprep.mubr.f32.mxu0 %v2550_v58 }
 0x2b0   :  { %v1236_v34 = vpop.f32.mrf.mxu0 }
 0x2b1   :  { %v1339_v8 = vadd.f32 %v1338_v61, %v1236_v34 }
 0x2b2   :  { %v1238_v12 = vpop.f32.mrf.mxu0 }
 0x2b3   :  { %v3167_v35 = vadd.f32 %v1368_v33, %v1339_v8  ;;  %v1341_v63 = vadd.f32 %v1340_v32, %v1238_v12 }
 0x2b4   :  { %v1242_v23 = vpop.f32.mrf.mxu0 }
 0x2b5   :  { %v3169_v1 = vadd.f32 %v1368_v33, %v1341_v63  ;;  %v1345_v52 = vadd.f32 %v1344_v4, %v1242_v23  ;;  %v1401_v57 = vsub.f32 0.0, %v3167_v35  ;;  %vm1393_vm1 = vcmp.ge.f32.partialorder %v3167_v35, 0.0 }
 0x2b6   :  { %v1244_v59 = vpop.f32.mrf.mxu0 }
 0x2b7   :  { %v1402_v36 = vsub.f32 0.0, %v3169_v1  ;;  %v3174_v31 = vadd.f32 %v1373_v28, %v1345_v52  ;;  %v1347_v22 = vadd.f32 %v1346_v48, %v1244_v59  ;;  %vm1394_vm4 = vcmp.ge.f32.partialorder %v3169_v1, 0.0 }
 0x2b8   :  { %v1248_v5 = vpop.f32.mrf.mxu0  ;;  %v1409_v37 = vsel %vm1393_vm1, %v1401_v57, %v3167_v35 }
 0x2b9   :  { %vm1395_vm6 = vcmp.ge.f32.partialorder %v3174_v31, 0.0  ;;  %v1403_v54 = vsub.f32 0.0, %v3174_v31  ;;  %v3179_v51 = vadd.f32 %v1373_v28, %v1347_v22  ;;  %v1351_v38 = vadd.f32 %v1350_v18, %v1248_v5 }
 0x2ba   :  { %v1250_v44 = vpop.f32.mrf.mxu0  ;;  %v1410_v40 = vsel %vm1394_vm4, %v1402_v36, %v3169_v1  ;;  %v1417_v60 = vmul.f32 1.442695, %v1409_v37 }
 0x2bb   :  { %v1411_v2 = vsel %vm1395_vm6, %v1403_v54, %v3174_v31  ;;  %v1404_v41 = vsub.f32 0.0, %v3179_v51  ;;  %v3191_v45 = vadd.f32 %v1378_v25, %v1351_v38  ;;  %v1353_v17 = vadd.f32 %v1352_v13, %v1250_v44 }
 0x2bc   :  { %v1421_v55 = vmul.f32 1.442695, %v1411_v2  ;;  %v1254_v56 = vpop.f32.mrf.mxu0  ;;  %vm1396_vm7 = vcmp.ge.f32.partialorder %v3179_v51, 0.0  ;;  %v1419_v7 = vmul.f32 1.442695, %v1410_v40 }
 0x2bd   :  { %vm1397_vm8 = vcmp.ge.f32.partialorder %v3191_v45, 0.0  ;;  %v1405_v9 = vsub.f32 0.0, %v3191_v45  ;;  %v3196_v10 = vadd.f32 %v1378_v25, %v1353_v17  ;;  %v1357_v11 = vadd.f32 %v1356_v39, %v1254_v56 }
 0x2be   :  { %2393 = vpow2.f32 %v1421_v55  ;;  %v1256_v30 = vpop.f32.mrf.mxu0  ;;  %v1412_v49 = vsel %vm1396_vm7, %v1404_v41, %v3179_v51 }
 0x2bf   :  { %v1413_v46 = vsel %vm1397_vm8, %v1405_v9, %v3191_v45  ;;  %v1406_v47 = vsub.f32 0.0, %v3196_v10  ;;  %v3205_v3 = vadd.f32 %v1383_v24, %v1357_v11  ;;  %v1359_v27 = vadd.f32 %v1358_v42, %v1256_v30 }
 0x2c0   :  { %v1425_v43 = vmul.f32 1.442695, %v1413_v46  ;;  %vm1398_vm9 = vcmp.ge.f32.partialorder %v3196_v10, 0.0  ;;  %v1423_v19 = vmul.f32 1.442695, %v1412_v49  ;;  %2395 = vpow2.f32 %v1419_v7 }
 0x2c1   :  { %vm1399_vm10 = vcmp.ge.f32.partialorder %v3205_v3, 0.0  ;;  %v1407_v20 = vsub.f32 0.0, %v3205_v3  ;;  %v1392_v21 = vadd.f32 %v1383_v24, %v1359_v27  ;;  %v1414_v0 = vsel %vm1398_vm9, %v1406_v47, %v3196_v10 }
 0x2c2   :  { %2397 = vpow2.f32 %v1425_v43  ;;  %v1427_v26 = vmul.f32 1.442695, %v1414_v0  ;;  %v1508_v0 = vpop.permute.xlu0 %1507 }
 0x2c3   :  { %v1415_v53 = vsel %vm1399_vm10, %v1407_v20, %v3205_v3  ;;  %v1408_v6 = vsub.f32 0.0, %v1392_v21  ;;  %vm1400_vm12 = vcmp.ge.f32.partialorder %v1392_v21, 0.0  ;;  %2399 = vpow2.f32 %v1423_v19 }
 0x2c4   :  { %v1429_v50 = vmul.f32 1.442695, %v1415_v53  ;;  %2401 = vpow2.f32 %v1427_v26 }
 0x2c5   :  { %2403 = vpow2.f32 %v1417_v60  ;;  %v1416_v29 = vsel %vm1400_vm12, %v1408_v6, %v1392_v21 }
 0x2c6   :  { %2405 = vpow2.f32 %v1429_v50  ;;  %v1431_v62 = vmul.f32 1.442695, %v1416_v29 }
 0x2c8   :  { %2407 = vpow2.f32 %v1431_v62  ;;  %v1498_v62 = vpop.permute.xlu0 %1497 }
 0x2cb   :  { %v2394_v61 = vpop.eup %2393 }
 0x2cc   :  { %v1435_v4 = vadd.f32 1.0, %v2394_v61 }
 0x2cd   :  { %v2396_v32 = vpop.eup %2395 }
 0x2ce   :  { %2409 = vrcp.f32 %v1435_v4  ;;  %v1434_v63 = vadd.f32 1.0, %v2396_v32 }
 0x2cf   :  { %v2398_v25 = vpop.eup %2397 }
 0x2d0   :  { %v2400_v48 = vpop.eup %2399  ;;  %v1437_v24 = vadd.f32 1.0, %v2398_v25 }
 0x2d1   :  { %v2402_v34 = vpop.eup %2401  ;;  %v1436_v33 = vadd.f32 1.0, %v2400_v48 }
 0x2d2   :  { %v2404_v8 = vpop.eup %2403  ;;  %v1438_v12 = vadd.f32 1.0, %v2402_v34  ;;  %2411 = vrcp.f32 %v1437_v24 }
 0x2d3   :  { %v2406_v18 = vpop.eup %2405  ;;  %v1433_v52 = vadd.f32 1.0, %v2404_v8 }
 0x2d4   :  { %v1439_v23 = vadd.f32 1.0, %v2406_v18  ;;  %2413 = vrcp.f32 %v1438_v12 }
 0x2d5   :  { %v2408_v28 = vpop.eup %2407  ;;  %2415 = vrcp.f32 %v1436_v33 }
 0x2d6   :  { %2417 = vrcp.f32 %v1439_v23  ;;  %v1440_v57 = vadd.f32 1.0, %v2408_v28 }
 0x2d7   :  { %2419 = vrcp.f32 %v1434_v63 }
 0x2d8   :  { %2421 = vrcp.f32 %v1440_v57 }
 0x2d9   :  { %2423 = vrcp.f32 %v1433_v52 }
 0x2db   :  { %v2410_v59 = vpop.eup %2409 }
 0x2dc   :  { %v1459_v55 = vmul.f32 %v2410_v59, %v2394_v61 }
 0x2de   :  { %v1467_v47 = vsel %vm1395_vm6, %v2410_v59, %v1459_v55 }
 0x2df   :  { %v2412_v13 = vpop.eup %2411  ;;  %v1475_v20 = vmul.f32 %v1467_v47, %v3174_v31  ;;  %v1482_v31 = vld [vmem:[%s3531_s6 + $0x8] sm:$0xff] }
 0x2e0   :  { %v1461_v39 = vmul.f32 %v2412_v13, %v2398_v25 }
 0x2e1   :  { %v2414_v36 = vpop.eup %2413 }
 0x2e2   :  { %v2416_v22 = vpop.eup %2415  ;;  %v1462_v37 = vmul.f32 %v2414_v36, %v2402_v34  ;;  %v1469_v60 = vsel %vm1397_vm8, %v2412_v13, %v1461_v39 }
 0x2e3   :  { %v2418_v5 = vpop.eup %2417  ;;  %v1460_v41 = vmul.f32 %v2416_v22, %v2400_v48  ;;  %v1477_v27 = vmul.f32 %v1469_v60, %v3191_v45  ;;  %v1481_v45 = vld [vmem:[%s3531_s6] sm:$0xff] }
 0x2e4   :  { %v2420_v54 = vpop.eup %2419  ;;  %v1463_v38 = vmul.f32 %v2418_v5, %v2406_v18  ;;  %v1470_v7 = vsel %vm1398_vm9, %v2414_v36, %v1462_v37 }
 0x2e5   :  { %v2422_v44 = vpop.eup %2421  ;;  %v1458_v9 = vmul.f32 %v2420_v54, %v2396_v32  ;;  %v1468_v49 = vsel %vm1396_vm7, %v2416_v22, %v1460_v41  ;;  %v1478_v46 = vmul.f32 %v1470_v7, %v3196_v10 }
 0x2e6   :  { %v2424_v40 = vpop.eup %2423  ;;  %v1464_v2 = vmul.f32 %v2422_v44, %v2408_v28  ;;  %v1471_v17 = vsel %vm1399_vm10, %v2418_v5, %v1463_v38  ;;  %v1476_v19 = vmul.f32 %v1468_v49, %v3179_v51  ;;  %v1503_v51 = vpop.permute.xlu1 %1502 }
 0x2e7   :  { %v1457_v42 = vmul.f32 %v2424_v40, %v2404_v8  ;;  %v1479_v30 = vmul.f32 %v1471_v17, %v3205_v3  ;;  %v1466_v43 = vsel %vm1394_vm4, %v2420_v54, %v1458_v9 }
 0x2e8   :  { %v1472_v56 = vsel %vm1400_vm12, %v2422_v44, %v1464_v2  ;;  %v1474_v10 = vmul.f32 %v1466_v43, %v3169_v1  ;;  %v1484_v1 = vld [vmem:[%s3531_s6 + $0x18] sm:$0xff] }
 0x2e9   :  { %v1480_v11 = vmul.f32 %v1472_v56, %v1392_v21  ;;  %v1465_v3 = vsel %vm1393_vm1, %v2424_v40, %v1457_v42 }
 0x2ea   :  { %v1473_v21 = vmul.f32 %v1465_v3, %v3167_v35  ;;  %v1483_v35 = vld [vmem:[%s3531_s6 + $0x10] sm:$0xff]  ;;  %v1493_v53 = vpop.permute.xlu1 %1492 }
 0x2eb   :  { %1546 = vmatprep.subr.mxu0 %v1480_v11 }
 0x2ec   :  { %1547 = vmatpush1.msra.mxu0 %v1479_v30 }
 0x2ed   :  { %1548 = vmatprep.subr.mxu0 %v1478_v46 }
 0x2ee   :  { %1549 = vmatpush1.msra.mxu0 %v1477_v27 }
 0x2ef   :  { %1550 = vmatprep.subr.mxu0 %v1476_v19 }
 0x2f0   :  { %1551 = vmatpush1.msra.mxu0 %v1475_v20 }
 0x2f1   :  { %1552 = vmatprep.subr.mxu0 %v1474_v10 }
 0x2f2   :  { %1553 = vmatpush1.msra.mxu0 %v1473_v21 }
 0x2f3   :  { %2316 = vmatmul.mubr.msk.f32.vlgmr.msra.gmra.mxu0 %vm1157_vm11, %v1481_v45 }
 0x2f4   :  { %1592 = vmatprep.mubr.f32.mxu0 %v2550_v58 }
 0x2f7   :  { %2317 = vmatmul.mubr.msk.f32.gmra.mxu0 %vm1157_vm11, %v1482_v31 }
 0x2f8   :  { %1598 = vmatprep.mubr.f32.mxu0 %v2550_v58 }
 0x2fb   :  { %2318 = vmatmul.mubr.msk.f32.gmra.mxu0 %vm1157_vm11, %v1483_v35 }
 0x2fc   :  { %1604 = vmatprep.mubr.f32.mxu0 %v2550_v58 }
 0x2ff   :  { %2319 = vmatmul.mubr.msk.f32.gmra.mxu0 %vm1157_vm11, %v1484_v1 }
 0x300   :  { %2024 = vmatprep.mubr.f32.mxu0 %v2550_v58 }
 0x3b3   :  { %v1588_v26 = vpop.f32.mrf.mxu0 }
 0x3b4   :  { %v3259_v6 = vadd.f32 %v1588_v26, %v1493_v53 }
 0x3b5   :  { %v1590_v50 = vpop.f32.mrf.mxu0 }
 0x3b6   :  { %v3261_v29 = vadd.f32 %v1590_v50, %v1493_v53  ;;  %vm1611_vm15 = vcmp.ge.f32.partialorder %v3259_v6, 0.0  ;;  %v1619_v25 = vsub.f32 0.0, %v3259_v6 }
 0x3b7   :  { %v1594_v61 = vpop.f32.mrf.mxu0 }
 0x3b8   :  { %v1620_v32 = vsub.f32 0.0, %v3261_v29  ;;  %v3264_v4 = vadd.f32 %v1594_v61, %v1498_v62  ;;  %vm1612_vm13 = vcmp.ge.f32.partialorder %v3261_v29, 0.0  ;;  %v1627_v28 = vsel %vm1611_vm15, %v1619_v25, %v3259_v6 }
 0x3b9   :  { %v1596_v48 = vpop.f32.mrf.mxu0  ;;  %v1635_v44 = vmul.f32 1.442695, %v1627_v28 }
 0x3ba   :  { %vm1613_vm0 = vcmp.ge.f32.partialorder %v3264_v4, 0.0  ;;  %v1621_v24 = vsub.f32 0.0, %v3264_v4  ;;  %v3271_v34 = vadd.f32 %v1596_v48, %v1498_v62  ;;  %v1628_v33 = vsel %vm1612_vm13, %v1620_v32, %v3261_v29 }
 0x3bb   :  { %v1600_v8 = vpop.f32.mrf.mxu0  ;;  %v1637_v12 = vmul.f32 1.442695, %v1628_v33 }
 0x3bc   :  { %v1629_v18 = vsel %vm1613_vm0, %v1621_v24, %v3264_v4  ;;  %v1622_v63 = vsub.f32 0.0, %v3271_v34  ;;  %v3280_v23 = vadd.f32 %v1600_v8, %v1503_v51  ;;  %vm1614_vm2 = vcmp.ge.f32.partialorder %v3271_v34, 0.0 }
 0x3bd   :  { %v1602_v52 = vpop.f32.mrf.mxu0  ;;  %v1639_v36 = vmul.f32 1.442695, %v1629_v18  ;;  %2425 = vpow2.f32 %v1637_v12 }
 0x3be   :  { %vm1615_vm3 = vcmp.ge.f32.partialorder %v3280_v23, 0.0  ;;  %v1623_v57 = vsub.f32 0.0, %v3280_v23  ;;  %v3288_v59 = vadd.f32 %v1602_v52, %v1503_v51  ;;  %v1630_v13 = vsel %vm1614_vm2, %v1622_v63, %v3271_v34 }
 0x3bf   :  { %v1606_v22 = vpop.f32.mrf.mxu0  ;;  %v1641_v5 = vmul.f32 1.442695, %v1630_v13 }
 0x3c0   :  { %v1631_v54 = vsel %vm1615_vm3, %v1623_v57, %v3280_v23  ;;  %v1624_v38 = vsub.f32 0.0, %v3288_v59  ;;  %v3297_v37 = vadd.f32 %v1606_v22, %v1508_v0  ;;  %vm1616_vm5 = vcmp.ge.f32.partialorder %v3288_v59, 0.0 }
 0x3c1   :  { %v1643_v39 = vmul.f32 1.442695, %v1631_v54  ;;  %v1608_v40 = vpop.f32.mrf.mxu0  ;;  %2427 = vpow2.f32 %v1641_v5 }
 0x3c2   :  { %vm1617_vm14 = vcmp.ge.f32.partialorder %v3297_v37, 0.0  ;;  %v1625_v2 = vsub.f32 0.0, %v3297_v37  ;;  %v1609_v41 = vadd.f32 %v1608_v40, %v1508_v0  ;;  %v1632_v17 = vsel %vm1616_vm5, %v1624_v38, %v3288_v59 }
 0x3c3   :  { %2429 = vpow2.f32 %v1643_v39  ;;  %v1645_v55 = vmul.f32 1.442695, %v1632_v17  ;;  %v1727_v17 = vpop.permute.xlu0 %1726 }
 0x3c4   :  { %2431 = vpow2.f32 %v1639_v36  ;;  %v1633_v56 = vsel %vm1617_vm14, %v1625_v2, %v3297_v37  ;;  %v1626_v7 = vsub.f32 0.0, %v1609_v41  ;;  %vm1618_vm1 = vcmp.ge.f32.partialorder %v1609_v41, 0.0 }
 0x3c5   :  { %v1647_v9 = vmul.f32 1.442695, %v1633_v56  ;;  %2433 = vpow2.f32 %v1645_v55 }
 0x3c6   :  { %2435 = vpow2.f32 %v1635_v44  ;;  %v1634_v11 = vsel %vm1618_vm1, %v1626_v7, %v1609_v41 }
 0x3c7   :  { %2437 = vpow2.f32 %v1647_v9  ;;  %v1649_v60 = vmul.f32 1.442695, %v1634_v11 }
 0x3c9   :  { %2439 = vpow2.f32 %v1649_v60  ;;  %v1717_v60 = vpop.permute.xlu0 %1716 }
 0x3ca   :  { %v2426_v42 = vpop.eup %2425 }
 0x3cb   :  { %v1652_v49 = vadd.f32 1.0, %v2426_v42 }
 0x3cd   :  { %2441 = vrcp.f32 %v1652_v49 }
 0x3ce   :  { %v2428_v30 = vpop.eup %2427 }
 0x3cf   :  { %v1654_v47 = vadd.f32 1.0, %v2428_v30 }
 0x3d0   :  { %v2430_v46 = vpop.eup %2429 }
 0x3d1   :  { %v2432_v27 = vpop.eup %2431  ;;  %v1655_v19 = vadd.f32 1.0, %v2430_v46  ;;  %2443 = vrcp.f32 %v1654_v47 }
 0x3d2   :  { %v2434_v43 = vpop.eup %2433  ;;  %v1653_v21 = vadd.f32 1.0, %v2432_v27 }
 0x3d3   :  { %v2436_v3 = vpop.eup %2435  ;;  %v1656_v20 = vadd.f32 1.0, %v2434_v43 }
 0x3d4   :  { %v2438_v10 = vpop.eup %2437  ;;  %v1651_v35 = vadd.f32 1.0, %v2436_v3 }
 0x3d5   :  { %v1657_v45 = vadd.f32 1.0, %v2438_v10  ;;  %2445 = vrcp.f32 %v1656_v20 }
 0x3d6   :  { %v2440_v31 = vpop.eup %2439  ;;  %2447 = vrcp.f32 %v1655_v19 }
 0x3d7   :  { %2449 = vrcp.f32 %v1657_v45  ;;  %v1658_v1 = vadd.f32 1.0, %v2440_v31 }
 0x3d8   :  { %2451 = vrcp.f32 %v1653_v21 }
 0x3d9   :  { %2453 = vrcp.f32 %v1658_v1 }
 0x3da   :  { %2455 = vrcp.f32 %v1651_v35  ;;  %v2442_v51 = vpop.eup %2441 }
 0x3db   :  { %v1676_v52 = vmul.f32 %v2442_v51, %v2426_v42 }
 0x3dd   :  { %v1684_v39 = vsel %vm1612_vm13, %v2442_v51, %v1676_v52 }
 0x3de   :  { %v2444_v0 = vpop.eup %2443 }
 0x3df   :  { %v1678_v8 = vmul.f32 %v2444_v0, %v2428_v30 }
 0x3e1   :  { %v1686_v5 = vsel %vm1614_vm2, %v2444_v0, %v1678_v8 }
 0x3e2   :  { %v2446_v26 = vpop.eup %2445  ;;  %v1694_v40 = vmul.f32 %v1686_v5, %v3271_v34  ;;  %v1722_v34 = vpop.permute.xlu1 %1721 }
 0x3e3   :  { %v2448_v53 = vpop.eup %2447  ;;  %v1680_v32 = vmul.f32 %v2446_v26, %v2434_v43 }
 0x3e4   :  { %v2450_v50 = vpop.eup %2449  ;;  %v1679_v48 = vmul.f32 %v2448_v53, %v2430_v46 }
 0x3e5   :  { %v2452_v62 = vpop.eup %2451  ;;  %v1681_v61 = vmul.f32 %v2450_v50, %v2438_v10  ;;  %v1688_v28 = vsel %vm1616_vm5, %v2446_v26, %v1680_v32 }
 0x3e6   :  { %v2454_v25 = vpop.eup %2453  ;;  %v1677_v18 = vmul.f32 %v2452_v62, %v2432_v27  ;;  %v1687_v13 = vsel %vm1615_vm3, %v2448_v53, %v1679_v48  ;;  %v1696_v54 = vmul.f32 %v1688_v28, %v3288_v59  ;;  %v1692_v59 = vmul.f32 %v1684_v39, %v3261_v29  ;;  %v2323_v29 = vld [vmem:[%s3531_s6 + $0x38] sm:$0xff]  ;;  %v1712_v56 = vpop.permute.xlu1 %1711 }
 0x3e7   :  { %v2456_v24 = vpop.eup %2455  ;;  %v1682_v33 = vmul.f32 %v2454_v25, %v2440_v31  ;;  %v1689_v12 = vsel %vm1617_vm14, %v2450_v50, %v1681_v61  ;;  %v1695_v44 = vmul.f32 %v1687_v13, %v3280_v23  ;;  %v2320_v23 = vld [vmem:[%s3531_s6 + $0x20] sm:$0xff] }
 0x3e8   :  { %v1675_v36 = vmul.f32 %v2456_v24, %v2436_v3  ;;  %v1697_v22 = vmul.f32 %v1689_v12, %v3297_v37  ;;  %v1685_v38 = vsel %vm1613_vm0, %v2452_v62, %v1677_v18 }
 0x3e9   :  { %v1690_v63 = vsel %vm1618_vm1, %v2454_v25, %v1682_v33  ;;  %v1693_v2 = vmul.f32 %v1685_v38, %v3264_v4  ;;  %v2321_v4 = vld [vmem:[%s3531_s6 + $0x28] sm:$0xff] }
 0x3ea   :  { %v1698_v57 = vmul.f32 %v1690_v63, %v1609_v41  ;;  %v1683_v37 = vsel %vm1611_vm15, %v2456_v24, %v1675_v36 }
 0x3eb   :  { %v1691_v41 = vmul.f32 %v1683_v37, %v3259_v6  ;;  %v2322_v6 = vld [vmem:[%s3531_s6 + $0x30] sm:$0xff] }
 0x3ec   :  { %1765 = vmatprep.subr.mxu1 %v1698_v57 }
 0x3ed   :  { %1766 = vmatpush1.msra.mxu1 %v1697_v22 }
 0x3ee   :  { %1767 = vmatprep.subr.mxu1 %v1696_v54 }
 0x3ef   :  { %1768 = vmatpush1.msra.mxu1 %v1695_v44 }
 0x3f0   :  { %1769 = vmatprep.subr.mxu1 %v1694_v40 }
 0x3f1   :  { %1770 = vmatpush1.msra.mxu1 %v1693_v2 }
 0x3f2   :  { %1771 = vmatprep.subr.mxu1 %v1692_v59 }
 0x3f3   :  { %1772 = vmatpush1.msra.mxu1 %v1691_v41 }
 0x3f4   :  { %2328 = vmatmul.mubr.msk.f32.vlgmr.msra.gmra.mxu1 %vm1157_vm11, %v2320_v23 }
 0x3f5   :  { %1811 = vmatprep.mubr.f32.mxu1 %v2550_v58 }
 0x3f8   :  { %2329 = vmatmul.mubr.msk.f32.gmra.mxu1 %vm1157_vm11, %v2321_v4 }
 0x3f9   :  { %1817 = vmatprep.mubr.f32.mxu1 %v2550_v58 }
 0x3fc   :  { %2330 = vmatmul.mubr.msk.f32.gmra.mxu1 %vm1157_vm11, %v2322_v6 }
 0x3fd   :  { %1823 = vmatprep.mubr.f32.mxu1 %v2550_v58 }
 0x400   :  { %2331 = vmatmul.mubr.msk.f32.gmra.mxu1 %vm1157_vm11, %v2323_v29 }
 0x401   :  { %2215 = vmatprep.mubr.f32.mxu1 %v2550_v58 }
 0x4b4   :  { %v1807_v55 = vpop.f32.mrf.mxu1 }
 0x4b5   :  { %v3351_v7 = vadd.f32 %v1807_v55, %v1712_v56 }
 0x4b6   :  { %v1809_v9 = vpop.f32.mrf.mxu1 }
 0x4b7   :  { %v3353_v11 = vadd.f32 %v1809_v9, %v1712_v56  ;;  %vm1830_vm6 = vcmp.ge.f32.partialorder %v3351_v7, 0.0  ;;  %v1838_v46 = vsub.f32 0.0, %v3351_v7 }
 0x4b8   :  { %v1813_v42 = vpop.f32.mrf.mxu1 }
 0x4b9   :  { %v1839_v30 = vsub.f32 0.0, %v3353_v11  ;;  %v3356_v49 = vadd.f32 %v1813_v42, %v1717_v60  ;;  %vm1831_vm4 = vcmp.ge.f32.partialorder %v3353_v11, 0.0  ;;  %v1846_v31 = vsel %vm1830_vm6, %v1838_v46, %v3351_v7 }
 0x4ba   :  { %v1815_v47 = vpop.f32.mrf.mxu1  ;;  %v1854_v25 = vmul.f32 1.442695, %v1846_v31 }
 0x4bb   :  { %vm1832_vm7 = vcmp.ge.f32.partialorder %v3356_v49, 0.0  ;;  %v1840_v27 = vsub.f32 0.0, %v3356_v49  ;;  %v3363_v43 = vadd.f32 %v1815_v47, %v1717_v60  ;;  %v1847_v19 = vsel %vm1831_vm4, %v1839_v30, %v3353_v11 }
 0x4bc   :  { %v1819_v3 = vpop.f32.mrf.mxu1  ;;  %v1856_v20 = vmul.f32 1.442695, %v1847_v19 }
 0x4bd   :  { %v1848_v10 = vsel %vm1832_vm7, %v1840_v27, %v3356_v49  ;;  %v1841_v21 = vsub.f32 0.0, %v3363_v43  ;;  %v3372_v45 = vadd.f32 %v1819_v3, %v1722_v34  ;;  %vm1833_vm8 = vcmp.ge.f32.partialorder %v3363_v43, 0.0 }
 0x4be   :  { %v1821_v35 = vpop.f32.mrf.mxu1  ;;  %v1858_v26 = vmul.f32 1.442695, %v1848_v10  ;;  %2457 = vpow2.f32 %v1856_v20 }
 0x4bf   :  { %vm1834_vm9 = vcmp.ge.f32.partialorder %v3372_v45, 0.0  ;;  %v1842_v1 = vsub.f32 0.0, %v3372_v45  ;;  %v3380_v51 = vadd.f32 %v1821_v35, %v1722_v34  ;;  %v1849_v0 = vsel %vm1833_vm8, %v1841_v21, %v3363_v43 }
 0x4c0   :  { %v1825_v53 = vpop.f32.mrf.mxu1  ;;  %v1860_v50 = vmul.f32 1.442695, %v1849_v0 }
 0x4c1   :  { %v1850_v62 = vsel %vm1834_vm9, %v1842_v1, %v3372_v45  ;;  %v1843_v61 = vsub.f32 0.0, %v3380_v51  ;;  %v3389_v32 = vadd.f32 %v1825_v53, %v1727_v17  ;;  %vm1835_vm10 = vcmp.ge.f32.partialorder %v3380_v51, 0.0 }
 0x4c2   :  { %v1862_v48 = vmul.f32 1.442695, %v1850_v62  ;;  %v1827_v24 = vpop.f32.mrf.mxu1  ;;  %2459 = vpow2.f32 %v1860_v50 }
 0x4c3   :  { %vm1836_vm12 = vcmp.ge.f32.partialorder %v3389_v32, 0.0  ;;  %v1844_v33 = vsub.f32 0.0, %v3389_v32  ;;  %v1828_v8 = vadd.f32 %v1827_v24, %v1727_v17  ;;  %v1851_v12 = vsel %vm1835_vm10, %v1843_v61, %v3380_v51 }
 0x4c4   :  { %2461 = vpow2.f32 %v1862_v48  ;;  %v1864_v18 = vmul.f32 1.442695, %v1851_v12  ;;  %v1946_v12 = vpop.permute.xlu0 %1945 }
 0x4c5   :  { %2463 = vpow2.f32 %v1858_v26  ;;  %v1852_v63 = vsel %vm1836_vm12, %v1844_v33, %v3389_v32  ;;  %v1845_v28 = vsub.f32 0.0, %v1828_v8  ;;  %vm1837_vm13 = vcmp.ge.f32.partialorder %v1828_v8, 0.0 }
 0x4c6   :  { %v1866_v52 = vmul.f32 1.442695, %v1852_v63  ;;  %2465 = vpow2.f32 %v1864_v18 }
 0x4c7   :  { %2467 = vpow2.f32 %v1854_v25  ;;  %v1853_v57 = vsel %vm1837_vm13, %v1845_v28, %v1828_v8 }
 0x4c8   :  { %2469 = vpow2.f32 %v1866_v52  ;;  %v1868_v13 = vmul.f32 1.442695, %v1853_v57 }
 0x4ca   :  { %2471 = vpow2.f32 %v1868_v13  ;;  %v1936_v13 = vpop.permute.xlu0 %1935 }
 0x4cb   :  { %v2458_v36 = vpop.eup %2457 }
 0x4cc   :  { %v1871_v5 = vadd.f32 1.0, %v2458_v36 }
 0x4ce   :  { %2473 = vrcp.f32 %v1871_v5 }
 0x4cf   :  { %v2460_v22 = vpop.eup %2459 }
 0x4d0   :  { %v1873_v38 = vadd.f32 1.0, %v2460_v22 }
 0x4d1   :  { %v2462_v54 = vpop.eup %2461 }
 0x4d2   :  { %v2464_v44 = vpop.eup %2463  ;;  %v1874_v40 = vadd.f32 1.0, %v2462_v54  ;;  %2475 = vrcp.f32 %v1873_v38 }
 0x4d3   :  { %v2466_v39 = vpop.eup %2465  ;;  %v1872_v41 = vadd.f32 1.0, %v2464_v44 }
 0x4d4   :  { %v2468_v37 = vpop.eup %2467  ;;  %v1875_v2 = vadd.f32 1.0, %v2466_v39 }
 0x4d5   :  { %v2470_v59 = vpop.eup %2469  ;;  %v1870_v6 = vadd.f32 1.0, %v2468_v37 }
 0x4d6   :  { %v1876_v23 = vadd.f32 1.0, %v2470_v59  ;;  %2477 = vrcp.f32 %v1875_v2 }
 0x4d7   :  { %v2472_v4 = vpop.eup %2471  ;;  %2479 = vrcp.f32 %v1874_v40 }
 0x4d8   :  { %2481 = vrcp.f32 %v1876_v23  ;;  %v1877_v29 = vadd.f32 1.0, %v2472_v4 }
 0x4d9   :  { %2483 = vrcp.f32 %v1872_v41 }
 0x4da   :  { %2485 = vrcp.f32 %v1877_v29 }
 0x4db   :  { %2487 = vrcp.f32 %v1870_v6  ;;  %v2474_v34 = vpop.eup %2473 }
 0x4dc   :  { %v1895_v35 = vmul.f32 %v2474_v34, %v2458_v36 }
 0x4de   :  { %v1903_v48 = vsel %vm1831_vm4, %v2474_v34, %v1895_v35 }
 0x4df   :  { %v2476_v17 = vpop.eup %2475 }
 0x4e0   :  { %v1897_v3 = vmul.f32 %v2476_v17, %v2460_v22 }
 0x4e2   :  { %v1905_v50 = vsel %vm1833_vm8, %v2476_v17, %v1897_v3 }
 0x4e3   :  { %v2478_v55 = vpop.eup %2477  ;;  %v1913_v24 = vmul.f32 %v1905_v50, %v3363_v43  ;;  %v1941_v43 = vpop.permute.xlu1 %1940 }
 0x4e4   :  { %v2480_v56 = vpop.eup %2479  ;;  %v1899_v30 = vmul.f32 %v2478_v55, %v2466_v39 }
 0x4e5   :  { %v2482_v9 = vpop.eup %2481  ;;  %v1898_v47 = vmul.f32 %v2480_v56, %v2462_v54 }
 0x4e6   :  { %v2484_v60 = vpop.eup %2483  ;;  %v1900_v42 = vmul.f32 %v2482_v9, %v2470_v59  ;;  %v1907_v31 = vsel %vm1835_vm10, %v2478_v55, %v1899_v30 }
 0x4e7   :  { %v2486_v46 = vpop.eup %2485  ;;  %v1896_v10 = vmul.f32 %v2484_v60, %v2464_v44  ;;  %v1906_v0 = vsel %vm1834_vm9, %v2480_v56, %v1898_v47  ;;  %v1915_v62 = vmul.f32 %v1907_v31, %v3380_v51  ;;  %v1911_v51 = vmul.f32 %v1903_v48, %v3353_v11  ;;  %v2335_v11 = vld [vmem:[%s3531_s6 + $0x58] sm:$0xff]  ;;  %v1931_v63 = vpop.permute.xlu1 %1930 }
 0x4e8   :  { %v2488_v27 = vpop.eup %2487  ;;  %v1901_v19 = vmul.f32 %v2486_v46, %v2472_v4  ;;  %v1908_v20 = vsel %vm1836_vm12, %v2482_v9, %v1900_v42  ;;  %v1914_v25 = vmul.f32 %v1906_v0, %v3372_v45  ;;  %v2332_v45 = vld [vmem:[%s3531_s6 + $0x40] sm:$0xff] }
 0x4e9   :  { %v1894_v26 = vmul.f32 %v2488_v27, %v2468_v37  ;;  %v1916_v53 = vmul.f32 %v1908_v20, %v3389_v32  ;;  %v1904_v61 = vsel %vm1832_vm7, %v2484_v60, %v1896_v10 }
 0x4ea   :  { %v1909_v21 = vsel %vm1837_vm13, %v2486_v46, %v1901_v19  ;;  %v1912_v33 = vmul.f32 %v1904_v61, %v3356_v49  ;;  %v2333_v49 = vld [vmem:[%s3531_s6 + $0x48] sm:$0xff] }
 0x4eb   :  { %v1917_v1 = vmul.f32 %v1909_v21, %v1828_v8  ;;  %v1902_v32 = vsel %vm1830_vm6, %v2488_v27, %v1894_v26  ;;  %vm2242_vm6 = vcmp.lt.s32.totalorder %v59_v14, 256 }
 0x4ec   :  { %v1910_v8 = vmul.f32 %v1902_v32, %v3351_v7  ;;  %v2334_v7 = vld [vmem:[%s3531_s6 + $0x50] sm:$0xff] }
 0x4ed   :  { %1984 = vmatprep.subr.mxu0 %v1917_v1 }
 0x4ee   :  { %1985 = vmatpush1.msra.mxu0 %v1916_v53 }
 0x4ef   :  { %1986 = vmatprep.subr.mxu0 %v1915_v62 }
 0x4f0   :  { %1987 = vmatpush1.msra.mxu0 %v1914_v25 }
 0x4f1   :  { %1988 = vmatprep.subr.mxu0 %v1913_v24 }
 0x4f2   :  { %1989 = vmatpush1.msra.mxu0 %v1912_v33 }
 0x4f3   :  { %1990 = vmatprep.subr.mxu0 %v1911_v51 }
 0x4f4   :  { %1991 = vmatpush1.msra.mxu0 %v1910_v8 }
 0x4f5   :  { %2340 = vmatmul.mubr.msk.f32.vlgmr.msra.gmra.mxu0 %vm1157_vm11, %v2332_v45 }
 0x4f6   :  { %2030 = vmatprep.mubr.f32.mxu0 %v2550_v58 }
 0x4f9   :  { %2341 = vmatmul.mubr.msk.f32.gmra.mxu0 %vm1157_vm11, %v2333_v49 }
 0x4fa   :  { %2036 = vmatprep.mubr.f32.mxu0 %v2550_v58 }
 0x4fd   :  { %2342 = vmatmul.mubr.msk.f32.gmra.mxu0 %vm1157_vm11, %v2334_v7 }
 0x4fe   :  { %2042 = vmatprep.mubr.f32.mxu0 %v2550_v58 }
 0x501   :  { %2343 = vmatmul.mubr.msk.f32.gmra.mxu0 %vm1157_vm11, %v2335_v11 }
 0x5b5   :  { %v2026_v18 = vpop.f32.mrf.mxu0 }
 0x5b6   :  { %v3442_v28 = vadd.f32 %v2026_v18, %v1931_v63 }
 0x5b7   :  { %v2028_v52 = vpop.f32.mrf.mxu0 }
 0x5b8   :  { %v3444_v57 = vadd.f32 %v2028_v52, %v1931_v63  ;;  %vm2049_vm0 = vcmp.ge.f32.partialorder %v3442_v28, 0.0  ;;  %v2057_v5 = vsub.f32 0.0, %v3442_v28 }
 0x5b9   :  { %v2032_v36 = vpop.f32.mrf.mxu0 }
 0x5ba   :  { %v2058_v22 = vsub.f32 0.0, %v3444_v57  ;;  %v3447_v58 = vadd.f32 %v2032_v36, %v1936_v13  ;;  %vm2050_vm15 = vcmp.ge.f32.partialorder %v3444_v57, 0.0  ;;  %v2065_v23 = vsel %vm2049_vm0, %v2057_v5, %v3442_v28 }
 0x5bb   :  { %v2034_v54 = vpop.f32.mrf.mxu0  ;;  %v2073_v30 = vmul.f32 1.442695, %v2065_v23 }
 0x5bc   :  { %vm2051_vm2 = vcmp.ge.f32.partialorder %v3447_v58, 0.0  ;;  %v2059_v38 = vsub.f32 0.0, %v3447_v58  ;;  %v3454_v44 = vadd.f32 %v2034_v54, %v1936_v13  ;;  %v2066_v39 = vsel %vm2050_vm15, %v2058_v22, %v3444_v57 }
 0x5bd   :  { %v2038_v40 = vpop.f32.mrf.mxu0  ;;  %v2075_v37 = vmul.f32 1.442695, %v2066_v39 }
 0x5be   :  { %v2067_v2 = vsel %vm2051_vm2, %v2059_v38, %v3447_v58  ;;  %v2060_v59 = vsub.f32 0.0, %v3454_v44  ;;  %v3463_v41 = vadd.f32 %v2038_v40, %v1941_v43  ;;  %vm2052_vm3 = vcmp.ge.f32.partialorder %v3454_v44, 0.0 }
 0x5bf   :  { %v2040_v4 = vpop.f32.mrf.mxu0  ;;  %v2077_v17 = vmul.f32 1.442695, %v2067_v2  ;;  %2489 = vpow2.f32 %v2075_v37 }
 0x5c0   :  { %vm2053_vm5 = vcmp.ge.f32.partialorder %v3463_v41, 0.0  ;;  %v2061_v6 = vsub.f32 0.0, %v3463_v41  ;;  %v3471_v29 = vadd.f32 %v2040_v4, %v1941_v43  ;;  %v2068_v34 = vsel %vm2052_vm3, %v2060_v59, %v3454_v44 }
 0x5c1   :  { %v2044_v55 = vpop.f32.mrf.mxu0  ;;  %v2079_v56 = vmul.f32 1.442695, %v2068_v34 }
 0x5c2   :  { %v2069_v9 = vsel %vm2053_vm5, %v2061_v6, %v3463_v41  ;;  %v2062_v60 = vsub.f32 0.0, %v3471_v29  ;;  %v3480_v42 = vadd.f32 %v2044_v55, %v1946_v12  ;;  %vm2054_vm14 = vcmp.ge.f32.partialorder %v3471_v29, 0.0 }
 0x5c3   :  { %v2081_v46 = vmul.f32 1.442695, %v2069_v9  ;;  %v2046_v47 = vpop.f32.mrf.mxu0  ;;  %2491 = vpow2.f32 %v2079_v56 }
 0x5c4   :  { %vm2055_vm1 = vcmp.ge.f32.partialorder %v3480_v42, 0.0  ;;  %v2063_v27 = vsub.f32 0.0, %v3480_v42  ;;  %v2047_v19 = vadd.f32 %v2046_v47, %v1946_v12  ;;  %v2070_v3 = vsel %vm2054_vm14, %v2062_v60, %v3471_v29 }
 0x5c5   :  { %2493 = vpow2.f32 %v2081_v46  ;;  %v2083_v20 = vmul.f32 1.442695, %v2070_v3  ;;  %v2142_v3 = vpop.permute.xlu0 %2141 }
 0x5c6   :  { %2495 = vpow2.f32 %v2077_v17  ;;  %v2071_v10 = vsel %vm2055_vm1, %v2063_v27, %v3480_v42  ;;  %v2064_v21 = vsub.f32 0.0, %v2047_v19  ;;  %vm2056_vm4 = vcmp.ge.f32.partialorder %v2047_v19, 0.0 }
 0x5c7   :  { %v2085_v31 = vmul.f32 1.442695, %v2071_v10  ;;  %2497 = vpow2.f32 %v2083_v20 }
 0x5c8   :  { %2499 = vpow2.f32 %v2073_v30  ;;  %v2072_v35 = vsel %vm2056_vm4, %v2064_v21, %v2047_v19 }
 0x5c9   :  { %2501 = vpow2.f32 %v2085_v31  ;;  %v2087_v1 = vmul.f32 1.442695, %v2072_v35 }
 0x5cb   :  { %2503 = vpow2.f32 %v2087_v1 }
 0x5cc   :  { %v2490_v0 = vpop.eup %2489 }
 0x5cd   :  { %v2090_v53 = vadd.f32 1.0, %v2490_v0 }
 0x5cf   :  { %2505 = vrcp.f32 %v2090_v53 }
 0x5d0   :  { %v2492_v26 = vpop.eup %2491 }
 0x5d1   :  { %v2092_v62 = vadd.f32 1.0, %v2492_v26 }
 0x5d2   :  { %v2494_v50 = vpop.eup %2493 }
 0x5d3   :  { %v2496_v61 = vpop.eup %2495  ;;  %v2093_v48 = vadd.f32 1.0, %v2494_v50  ;;  %2507 = vrcp.f32 %v2092_v62 }
 0x5d4   :  { %v2498_v25 = vpop.eup %2497  ;;  %v2091_v51 = vadd.f32 1.0, %v2496_v61 }
 0x5d5   :  { %v2500_v24 = vpop.eup %2499  ;;  %v2094_v32 = vadd.f32 1.0, %v2498_v25 }
 0x5d6   :  { %v2502_v33 = vpop.eup %2501  ;;  %v2089_v49 = vadd.f32 1.0, %v2500_v24 }
 0x5d7   :  { %v2095_v8 = vadd.f32 1.0, %v2502_v33  ;;  %2509 = vrcp.f32 %v2094_v32 }
 0x5d8   :  { %v2504_v45 = vpop.eup %2503  ;;  %2511 = vrcp.f32 %v2093_v48 }
 0x5d9   :  { %2513 = vrcp.f32 %v2095_v8  ;;  %v2096_v7 = vadd.f32 1.0, %v2504_v45 }
 0x5da   :  { %2515 = vrcp.f32 %v2091_v51 }
 0x5db   :  { %2517 = vrcp.f32 %v2096_v7 }
 0x5dc   :  { %2519 = vrcp.f32 %v2089_v49  ;;  %v2506_v11 = vpop.eup %2505 }
 0x5dd   :  { %v2114_v23 = vmul.f32 %v2506_v11, %v2490_v0 }
 0x5df   :  { %v2122_v30 = vsel %vm2050_vm15, %v2506_v11, %v2114_v23 }
 0x5e0   :  { %v2508_v43 = vpop.eup %2507 }
 0x5e1   :  { %v2116_v39 = vmul.f32 %v2508_v43, %v2492_v26 }
 0x5e3   :  { %v2124_v55 = vsel %vm2052_vm3, %v2508_v43, %v2116_v39 }
 0x5e4   :  { %v2510_v12 = vpop.eup %2509  ;;  %v2132_v46 = vmul.f32 %v2124_v55, %v3454_v44  ;;  %v2551_v44 = vmov 1966171168  }
 0x5e5   :  { %v2512_v18 = vpop.eup %2511  ;;  %v2118_v36 = vmul.f32 %v2510_v12, %v2498_v25 }
 0x5e6   :  { %v2514_v63 = vpop.eup %2513  ;;  %v2117_v5 = vmul.f32 %v2512_v18, %v2494_v50 }
 0x5e7   :  { %v2516_v52 = vpop.eup %2515  ;;  %v2119_v13 = vmul.f32 %v2514_v63, %v2502_v33  ;;  %v2126_v59 = vsel %vm2054_vm14, %v2510_v12, %v2118_v36 }
 0x5e8   :  { %v2518_v22 = vpop.eup %2517  ;;  %v2115_v37 = vmul.f32 %v2516_v52, %v2496_v61  ;;  %v2125_v6 = vsel %vm2053_vm5, %v2512_v18, %v2117_v5  ;;  %v2134_v56 = vmul.f32 %v2126_v59, %v3471_v29  ;;  %v2130_v29 = vmul.f32 %v2122_v30, %v3444_v57 }
 0x5e9   :  { %v2520_v54 = vpop.eup %2519  ;;  %v2120_v38 = vmul.f32 %v2518_v22, %v2504_v45  ;;  %v2127_v40 = vsel %vm2055_vm1, %v2514_v63, %v2119_v13  ;;  %v2133_v60 = vmul.f32 %v2125_v6, %v3463_v41  ;;  %v2137_v41 = vld [vmem:[%s3533_s8] sm:$0x1]  ;;  %s2251_s8 = sshll.u32 %s2552_s26, 4  ;;  %s2252_s8 = int_to_ptr.vmem [resolvable:$true] %s2251_s8 }
 0x5ea   :  { %v2113_v34 = vmul.f32 %v2520_v54, %v2500_v24  ;;  %v2135_v17 = vmul.f32 %v2127_v40, %v3480_v42  ;;  %v2123_v9 = vsel %vm2051_vm2, %v2516_v52, %v2115_v37  ;;  %s2521_s27 = scalar_lea.vmem %s2252_s8, 32  ;;  %p2526_p1 = scmp.lt.s32.totalorder %s2252_s8, %s2252_s8 }
 0x5eb   :  { %v2128_v2 = vsel %vm2056_vm4, %v2518_v22, %v2120_v38  ;;  %v2131_v47 = vmul.f32 %v2123_v9, %v3447_v58  ;;  %v2147_v58 = vrot.slane %v2142_v3, %v61_v16  ;;  %p2522_p0 = scmp.ne.s32.totalorder %s2252_s8, %s2521_s27  ;;  %p2527_p2 = scmp.lt.s32.totalorder %s2521_s27, %s2521_s27 }
 0x5ec   :  { %v2136_v4 = vmul.f32 %v2128_v2, %v2047_v19  ;;  %v2121_v42 = vsel %vm2049_vm0, %v2520_v54, %v2113_v34  ;;  %v2226_v19 = vunpack.c.l.s4 %v2551_v44 }
 0x5ed   :  { %v2129_v27 = vmul.f32 %v2121_v42, %v3442_v28  ;;  %p2528_p3 = por %p2527_p2, %p2526_p1 }
 0x5ee   :  { %2175 = vmatprep.subr.mxu1 %v2136_v4  ;;  %v2227_v20 = vunpack.c.0.s8 %v2226_v19 }
 0x5ef   :  { %2176 = vmatpush1.msra.mxu1 %v2135_v17  ;;  %p2529_p4 = pnand %p2528_p3, %p2522_p0 }
 0x5f0   :  { %2177 = vmatprep.subr.mxu1 %v2134_v56  ;;  %v2230_v28 = vsub.s32 %v2227_v20, %v2645_v15 }
 0x5f1   :  { %2178 = vmatpush1.msra.mxu1 %v2133_v60 }
 0x5f2   :  { %2179 = vmatprep.subr.mxu1 %v2132_v46 }
 0x5f3   :  { %2180 = vmatpush1.msra.mxu1 %v2131_v47 }
 0x5f4   :  { %2181 = vmatprep.subr.mxu1 %v2130_v29 }
 0x5f5   :  { %2182 = vmatpush1.msra.mxu1 %v2129_v27 }
 0x5f6   :  { %2344 = vmatmul.mubr.msk.f32.vlgmr.msra.gmra.mxu1 %vm1157_vm11, %v2137_v41 }
 0x6b6   :  { %v2217_v10 = vpop.f32.mrf.mxu1 }
 0x6b7   :  { %v2218_v21 = vadd.f32 %v2217_v10, %v2147_v58 }
 0x6b8   :  { %v2219_v57 = vpop.f32.mrf.mxu1 }
 0x6b9   :  { %v2220_v31 = vadd.f32 %v2219_v57, %v2147_v58 }
 0x6bb   :  { %v2224_v35 = vcombine.low %v2218_v21, %v2220_v31 }
 0x6bd   :  { %v2231_v1 = vrot.slane %v2224_v35, %v2230_v28 }
 0x6bf   :  { %v2238_v0 = vrot.slane %v2231_v1, %v2230_v28 }
 0x6c1   :  { %2244 = vst.msk [vmem:[#allocation3] sm:$0x3] %vm2242_vm6, %v2238_v0 }
 0x6c2   :  { %2532 = shalt.err (!%p2529_p4)
}
 0x6c3   :  { %2254 = dma.vmem_to_hbm [thread:$0]  %s2252_s8, 32, %s3535_s10, [#allocation4]  }
 0x6c4   :  { %2541 = dma.done.wait [#allocation4], 32  }
 0x6c5   :  { %2542 = vsyncadd [#allocation4], 4294967264 }
 0x6c6   :  { %2258 = vsyncpa [#allocation4], 1 }

</bundles_post_ra>
